<compile_context>
chip_gen: v6e
topology: v6e:2x2x1
jax: 0.10.0
libtpu: 0.0.40
codegen_flags: <defaults>
</compile_context>

<pallas_src>
import functools

import jax
import jax.numpy as jnp
from jax.experimental import pallas as pl
from jax.experimental.pallas import tpu as pltpu


def _round_up(n, m):
    return ((n + m - 1) // m) * m


def _mlp_kernel(x_ref, w1t_ref, b1_ref, w2t_ref, o_ref, *, compute_dtype):
    # fc1: x @ W1^T (MXU, f32 accumulate) + b1 -> tanh (EUP) -> fc2 (MXU).
    # The 1/hidden^beta scale is already folded into W2^T.
    mm_precision = (jax.lax.Precision.HIGHEST
                    if jnp.dtype(compute_dtype) == jnp.float32
                    else jax.lax.Precision.DEFAULT)
    x = x_ref[...].astype(compute_dtype)
    h = jnp.dot(x, w1t_ref[...], preferred_element_type=jnp.float32,
                precision=mm_precision)
    h = jnp.tanh(h + b1_ref[...])          # b1 is (1, hidden) -> broadcasts over batch
    out = jnp.dot(h.astype(compute_dtype), w2t_ref[...],
                  preferred_element_type=jnp.float32, precision=mm_precision)
    o_ref[...] = out.astype(o_ref.dtype)


def prepare_params(fc1_weight, fc1_bias, fc2_weight, beta, *,
                   compute_dtype=jnp.float32):
    """One-time weight prep (hoisted out of the per-call path).

    - Pre-transpose to row-major matmul layout.
    - Fold the 1/hidden^beta scale into W2^T (before any low-precision cast).
    - Zero-pad input/hidden/output dims to multiples of 128 so every MXU operand
      and the output store are lane-dense. Exact: padded x cols hit zero W1^T
      rows, padded hidden lanes are tanh(0)=0 and hit zero W2^T rows.
    - Optionally cast matmul operands to bf16 (f32 accumulation in-kernel);
      fine on v5e/v6e/v7x (the MXU is bf16-native on all of them).
    """
    hidden_dim, input_dim = fc1_weight.shape
    output_dim = fc2_weight.shape[0]
    in_pad = _round_up(input_dim, 128)
    hid_pad = _round_up(hidden_dim, 128)
    out_pad = _round_up(output_dim, 128)

    scale = 1.0 / (float(hidden_dim) ** float(beta))

    w1t = jnp.pad(fc1_weight.T.astype(jnp.float32),
                  ((0, in_pad - input_dim), (0, hid_pad - hidden_dim)))
    b1 = jnp.pad(fc1_bias.astype(jnp.float32),
                 (0, hid_pad - hidden_dim)).reshape(1, hid_pad)
    w2t = jnp.pad(fc2_weight.T.astype(jnp.float32) * scale,
                  ((0, hid_pad - hidden_dim), (0, out_pad - output_dim)))

    w1t = w1t.astype(compute_dtype)
    w2t = w2t.astype(compute_dtype)
    return w1t, b1, w2t, input_dim, output_dim


def _vmem_capacity_bytes():
    try:
        info = pltpu.get_tpu_info()
        cap = int(getattr(info, "vmem_capacity_bytes", 0) or 0)
        if cap > 0:
            return cap
    except Exception:
        pass
    return 64 * 1024 * 1024   # conservative default (v7x per-TC VMEM)


def _pick_batch_tile(batch, row_bytes, resident_bytes, budget, *,
                     max_tile, hbm_row_bytes, min_step_bytes=1 << 20):
    """Largest MXU-friendly batch tile that fits the VMEM budget.

    Ensures >=2 grid steps (v7x has two TensorCores sharing the 'parallel'
    batch axis) whenever each step still moves >= min_step_bytes of x/out HBM
    traffic, so the ~0.35us per-step overhead stays amortized.
    """
    batch8 = _round_up(batch, 8)
    avail = budget - resident_bytes
    if avail < 8 * row_bytes:
        # TODO(synk): fall back to a K/N-tiled weight pipeline with a
        # pl.when-guarded f32 accumulator when weights outgrow VMEM residency.
        raise ValueError("resident weights leave no VMEM for even an 8-row tile")
    tile_cap = max(8, min(max_tile, (avail // row_bytes) // 8 * 8, batch8))
    steps = pl.cdiv(batch8, tile_cap)
    if steps < 2 and batch8 * hbm_row_bytes >= 2 * min_step_bytes:
        steps = 2
    tb = _round_up(pl.cdiv(batch8, steps), 8)
    # MXU-friendly row counts (256-wide passes on v6e/v7x, 128 on v5e), but do
    # not inflate batch zero-padding by more than ~12.5% to get them.
    for a in (256, 128):
        if tb >= a:
            cand = _round_up(tb, a)
            if (cand <= tile_cap
                    and _round_up(batch8, cand) - batch8 <= max(batch8 // 8, a)):
                tb = cand
            break
    return min(tb, tile_cap)


def _forward_impl(x, w1t, b1, w2t, output_dim, *, max_batch_tile,
                  single_buffer_weights):
    batch, in_dim_x = x.shape
    in_pad, hid_pad = w1t.shape
    out_pad = w2t.shape[1]
    compute_dtype = w1t.dtype
    w_bytes = jnp.dtype(compute_dtype).itemsize
    x_bytes = jnp.dtype(x.dtype).itemsize

    # Pad x columns to the lane-padded input dim (exact: padded W1^T rows are 0).
    if in_dim_x != in_pad:
        x = jnp.pad(x, ((0, 0), (0, in_pad - in_dim_x)))

    vmem_cap = _vmem_capacity_bytes()
    budget = (vmem_cap * 3) // 4          # ~48 MiB on v7x, ~96 MiB on v5e/v6e

    weight_buffers = 1 if single_buffer_weights else 2
    resident_bytes = weight_buffers * (
        (in_pad * hid_pad + hid_pad * out_pad) * w_bytes + hid_pad * 4)

    # Per-batch-row VMEM: double-buffered x and out tiles, f32 h intermediate,
    # f32 pre-cast output, plus bf16 casts of x / h when compute_dtype != f32.
    row_bytes = (2 * in_pad * x_bytes + 2 * out_pad * x_bytes
                 + hid_pad * 4 + out_pad * 4)
    if jnp.dtype(compute_dtype) != jnp.dtype(x.dtype):
        row_bytes += in_pad * w_bytes
    if jnp.dtype(compute_dtype) != jnp.float32:
        row_bytes += hid_pad * w_bytes

    hbm_row_bytes = (in_pad + out_pad) * x_bytes
    tb = _pick_batch_tile(batch, row_bytes, resident_bytes, budget,
                          max_tile=max_batch_tile, hbm_row_bytes=hbm_row_bytes)

    padded_batch = _round_up(batch, tb)
    if padded_batch != batch:
        x = jnp.pad(x, ((0, padded_batch - batch), (0, 0)))
    grid = (padded_batch // tb,)

    vmem_need = resident_bytes + tb * row_bytes
    vmem_limit = int(min(max(vmem_need + vmem_need // 4 + (4 << 20), 32 << 20),
                         (vmem_cap * 7) // 8))

    cost = pl.CostEstimate(
        flops=2 * padded_batch * (in_pad * hid_pad + hid_pad * out_pad),
        transcendentals=padded_batch * hid_pad,
        bytes_accessed=int(
            padded_batch * (in_pad + out_pad) * x_bytes
            + (in_pad * hid_pad + hid_pad * out_pad) * w_bytes + hid_pad * 4),
    )

    kernel = functools.partial(_mlp_kernel, compute_dtype=compute_dtype)

    resident_kwargs = {}
    if single_buffer_weights:
        # Constant-index blocks don't need double buffering; halves their VMEM.
        resident_kwargs = dict(pipeline_mode=pl.Buffered(1))

    out = pl.pallas_call(
        kernel,
        out_shape=jax.ShapeDtypeStruct((padded_batch, out_pad), x.dtype),
        grid_spec=pltpu.PrefetchScalarGridSpec(
            num_scalar_prefetch=0,
            grid=grid,
            in_specs=[
                pl.BlockSpec((tb, in_pad), lambda i: (i, 0)),                   # x tile
                pl.BlockSpec((in_pad, hid_pad), lambda i: (0, 0),
                             **resident_kwargs),                                # W1^T resident
                pl.BlockSpec((1, hid_pad), lambda i: (0, 0),
                             **resident_kwargs),                                # b1 resident
                pl.BlockSpec((hid_pad, out_pad), lambda i: (0, 0),
                             **resident_kwargs),                                # W2^T resident
            ],
            out_specs=pl.BlockSpec((tb, out_pad), lambda i: (i, 0)),
        ),
        compiler_params=pltpu.CompilerParams(
            dimension_semantics=("parallel",),   # batch tiles shard across TCs (v7x)
            vmem_limit_bytes=vmem_limit,
        ),
        cost_estimate=cost,
    )(x, w1t, b1, w2t)

    # Consumers that can accept the padded (padded_batch, out_pad) layout should
    # skip this slice to avoid the extra XLA copy for tiny output dims.
    return out[:batch, :output_dim]


def nn_forward(x, w1t, b1, w2t, input_dim, output_dim, *, max_batch_tile=4096):
    """Pallas TPU implementation of NN.forward on pre-prepared params."""
    assert x.shape[1] == input_dim, (x.shape, input_dim)
    try:
        return _forward_impl(x, w1t, b1, w2t, output_dim,
                             max_batch_tile=max_batch_tile,
                             single_buffer_weights=True)
    except Exception:
        # pl.Buffered(1) not accepted by this Pallas version: fall back to the
        # default double-buffered resident weights (budget recomputed for 2x).
        return _forward_impl(x, w1t, b1, w2t, output_dim,
                             max_batch_tile=max_batch_tile,
                             single_buffer_weights=False)


if __name__ == "__main__":
    # Small shapes consistent with the module's forward.
    batch, input_dim, hidden_dim, output_dim = 8, 4, 32, 2
    beta = 0.5

    key = jax.random.PRNGKey(0)
    kx, kw1, kb1, kw2 = jax.random.split(key, 4)

    # Deterministic parameter init matching NN._initialize_weights:
    #   fc1.weight ~ Normal(0,1), fc1.bias ~ Normal(0,1), fc2.weight ~ Uniform(-1,1)
    x = jax.random.normal(kx, (batch, input_dim), dtype=jnp.float32)
    fc1_weight = jax.random.normal(kw1, (hidden_dim, input_dim), dtype=jnp.float32)
    fc1_bias = jax.random.normal(kb1, (hidden_dim,), dtype=jnp.float32)
    fc2_weight = jax.random.uniform(
        kw2, (output_dim, hidden_dim), dtype=jnp.float32, minval=-1.0, maxval=1.0)

    # Reference in plain JAX (same math as the PyTorch module), true-f32 matmuls.
    hp = jax.lax.Precision.HIGHEST
    ref = jnp.dot(jnp.tanh(jnp.dot(x, fc1_weight.T, precision=hp) + fc1_bias),
                  fc2_weight.T, precision=hp) / (hidden_dim ** beta)

    # f32 compute path: exact match.
    params_f32 = prepare_params(fc1_weight, fc1_bias, fc2_weight, beta,
                                compute_dtype=jnp.float32)
    out = jax.block_until_ready(nn_forward(x, *params_f32))
    assert out.shape == (batch, output_dim)
    assert jnp.allclose(out, ref, atol=1e-5, rtol=1e-5), \
        f"f32 max err {jnp.max(jnp.abs(out - ref))}"

    # bf16 matmul operands, f32 accumulation (MXU throughput path on v5e/v6e/v7x).
    # Dominant error source: post-tanh activations cast to bf16 before fc2.
    params_bf16 = prepare_params(fc1_weight, fc1_bias, fc2_weight, beta,
                                 compute_dtype=jnp.bfloat16)
    out_bf16 = jax.block_until_ready(nn_forward(x, *params_bf16))
    assert out_bf16.shape == (batch, output_dim)
    assert jnp.allclose(out_bf16, ref, atol=5e-2, rtol=5e-2), \
        f"bf16 max err {jnp.max(jnp.abs(out_bf16 - ref))}"

    print("KERNEL_OK")
</pallas_src>

<mosaic_0001>
module attributes {stable_mosaic.version = 11 : i64} {
  func.func @_mlp_kernel(%arg0: i32, %arg1: memref<8x128xf32, #tpu.memory_space<vmem>>, %arg2: memref<128x128xf32, #tpu.memory_space<vmem>>, %arg3: memref<1x128xf32, #tpu.memory_space<vmem>>, %arg4: memref<128x128xf32, #tpu.memory_space<vmem>>, %arg5: memref<8x128xf32, #tpu.memory_space<vmem>>) attributes {dimension_semantics = [#tpu.dimension_semantics<parallel>], iteration_bounds = array<i64: 1>, scalar_prefetch = 0 : i64, scratch_operands = 0 : i64, tpu.core_type = #tpu.core_type<tc>, window_params = [{transform_indices = @transform_0, window_bounds = array<i64: 8, 128>}, {pipeline_mode = #tpu.pipeline_mode<synchronous>, transform_indices = @transform_1, window_bounds = array<i64: 128, 128>}, {pipeline_mode = #tpu.pipeline_mode<synchronous>, transform_indices = @transform_2, window_bounds = array<i64: 1, 128>}, {pipeline_mode = #tpu.pipeline_mode<synchronous>, transform_indices = @transform_3, window_bounds = array<i64: 128, 128>}, {transform_indices = @transform_4, window_bounds = array<i64: 8, 128>}]} {
    %c0 = arith.constant 0 : index
    %c0_0 = arith.constant 0 : index
    %0 = vector.load %arg1[%c0, %c0_0] : memref<8x128xf32, #tpu.memory_space<vmem>>, vector<8x128xf32>
    %c0_1 = arith.constant 0 : index
    %c0_2 = arith.constant 0 : index
    %1 = vector.load %arg2[%c0_1, %c0_2] : memref<128x128xf32, #tpu.memory_space<vmem>>, vector<128x128xf32>
    %cst = arith.constant dense<0.000000e+00> : vector<8x128xf32>
    %2 = tpu.matmul %0, %1, %cst {dimension_numbers = #tpu.dot_dimension_numbers<[1], [0], [0], [1], [0, 0, 1, 1], [], []>, precision = #tpu.contract_precision<fp32>} : vector<8x128xf32>, vector<128x128xf32>, vector<8x128xf32> -> vector<8x128xf32>
    %c0_3 = arith.constant 0 : index
    %c0_4 = arith.constant 0 : index
    %3 = vector.load %arg3[%c0_3, %c0_4] : memref<1x128xf32, #tpu.memory_space<vmem>>, vector<1x128xf32>
    %4 = vector.broadcast %3 : vector<1x128xf32> to vector<8x128xf32>
    %5 = arith.addf %2, %4 : vector<8x128xf32>
    %6 = math.tanh %5 : vector<8x128xf32>
    %c0_5 = arith.constant 0 : index
    %c0_6 = arith.constant 0 : index
    %7 = vector.load %arg4[%c0_5, %c0_6] : memref<128x128xf32, #tpu.memory_space<vmem>>, vector<128x128xf32>
    %cst_7 = arith.constant dense<0.000000e+00> : vector<8x128xf32>
    %8 = tpu.matmul %6, %7, %cst_7 {dimension_numbers = #tpu.dot_dimension_numbers<[1], [0], [0], [1], [0, 0, 1, 1], [], []>, precision = #tpu.contract_precision<fp32>} : vector<8x128xf32>, vector<128x128xf32>, vector<8x128xf32> -> vector<8x128xf32>
    %c0_8 = arith.constant 0 : index
    %c0_9 = arith.constant 0 : index
    %9 = vector.load %arg5[%c0_8, %c0_9] : memref<8x128xf32, #tpu.memory_space<vmem>>, vector<8x128xf32>
    tpu.vector_store %arg5[%c0_8, %c0_9], %8 {strides = array<i32>} : memref<8x128xf32, #tpu.memory_space<vmem>>, vector<8x128xf32>,
    return
  }
  func.func @transform_0(%arg0: i32) -> (i32, i32) {
    %c0_i32 = arith.constant 0 : i32
    %c0_i32_0 = arith.constant 0 : i32
    return %arg0, %c0_i32 : i32, i32
  }
  func.func @transform_1(%arg0: i32) -> (i32, i32) {
    %c0_i32 = arith.constant 0 : i32
    %c0_i32_0 = arith.constant 0 : i32
    %c0_i32_1 = arith.constant 0 : i32
    return %c0_i32, %c0_i32_0 : i32, i32
  }
  func.func @transform_2(%arg0: i32) -> (i32, i32) {
    %c0_i32 = arith.constant 0 : i32
    %c0_i32_0 = arith.constant 0 : i32
    %c0_i32_1 = arith.constant 0 : i32
    return %c0_i32, %c0_i32_0 : i32, i32
  }
  func.func @transform_3(%arg0: i32) -> (i32, i32) {
    %c0_i32 = arith.constant 0 : i32
    %c0_i32_0 = arith.constant 0 : i32
    %c0_i32_1 = arith.constant 0 : i32
    return %c0_i32, %c0_i32_0 : i32, i32
  }
  func.func @transform_4(%arg0: i32) -> (i32, i32) {
    %c0_i32 = arith.constant 0 : i32
    %c0_i32_0 = arith.constant 0 : i32
    return %arg0, %c0_i32 : i32, i32
  }
}

module attributes {stable_mosaic.version = 11 : i64} {
  func.func @_mlp_kernel(%arg0: i32, %arg1: memref<8x128xf32, #tpu.memory_space<vmem>>, %arg2: memref<128x128xf32, #tpu.memory_space<vmem>>, %arg3: memref<1x128xf32, #tpu.memory_space<vmem>>, %arg4: memref<128x128xf32, #tpu.memory_space<vmem>>, %arg5: memref<8x128xf32, #tpu.memory_space<vmem>>) attributes {dimension_semantics = [#tpu.dimension_semantics<parallel>], iteration_bounds = array<i64: 1>, scalar_prefetch = 0 : i64, scratch_operands = 0 : i64, tpu.core_type = #tpu.core_type<tc>, window_params = [{transform_indices = @transform_0, window_bounds = array<i64: 8, 128>}, {pipeline_mode = #tpu.pipeline_mode<synchronous>, transform_indices = @transform_1, window_bounds = array<i64: 128, 128>}, {pipeline_mode = #tpu.pipeline_mode<synchronous>, transform_indices = @transform_2, window_bounds = array<i64: 1, 128>}, {pipeline_mode = #tpu.pipeline_mode<synchronous>, transform_indices = @transform_3, window_bounds = array<i64: 128, 128>}, {transform_indices = @transform_4, window_bounds = array<i64: 8, 128>}]} {
    %c0 = arith.constant 0 : index
    %c0_0 = arith.constant 0 : index
    %0 = vector.load %arg1[%c0, %c0_0] : memref<8x128xf32, #tpu.memory_space<vmem>>, vector<8x128xf32>
    %c0_1 = arith.constant 0 : index
    %c0_2 = arith.constant 0 : index
    %1 = vector.load %arg2[%c0_1, %c0_2] : memref<128x128xf32, #tpu.memory_space<vmem>>, vector<128x128xf32>
    %cst = arith.constant dense<0.000000e+00> : vector<8x128xf32>
    %2 = tpu.matmul %0, %1, %cst {dimension_numbers = #tpu.dot_dimension_numbers<[1], [0], [0], [1], [0, 0, 1, 1], [], []>, precision = #tpu.contract_precision<fp32>} : vector<8x128xf32>, vector<128x128xf32>, vector<8x128xf32> -> vector<8x128xf32>
    %c0_3 = arith.constant 0 : index
    %c0_4 = arith.constant 0 : index
    %3 = vector.load %arg3[%c0_3, %c0_4] : memref<1x128xf32, #tpu.memory_space<vmem>>, vector<1x128xf32>
    %4 = vector.broadcast %3 : vector<1x128xf32> to vector<8x128xf32>
    %5 = arith.addf %2, %4 : vector<8x128xf32>
    %6 = math.tanh %5 : vector<8x128xf32>
    %c0_5 = arith.constant 0 : index
    %c0_6 = arith.constant 0 : index
    %7 = vector.load %arg4[%c0_5, %c0_6] : memref<128x128xf32, #tpu.memory_space<vmem>>, vector<128x128xf32>
    %cst_7 = arith.constant dense<0.000000e+00> : vector<8x128xf32>
    %8 = tpu.matmul %6, %7, %cst_7 {dimension_numbers = #tpu.dot_dimension_numbers<[1], [0], [0], [1], [0, 0, 1, 1], [], []>, precision = #tpu.contract_precision<fp32>} : vector<8x128xf32>, vector<128x128xf32>, vector<8x128xf32> -> vector<8x128xf32>
    %c0_8 = arith.constant 0 : index
    %c0_9 = arith.constant 0 : index
    %9 = vector.load %arg5[%c0_8, %c0_9] : memref<8x128xf32, #tpu.memory_space<vmem>>, vector<8x128xf32>
    tpu.vector_store %arg5[%c0_8, %c0_9], %8 {strides = array<i32>} : memref<8x128xf32, #tpu.memory_space<vmem>>, vector<8x128xf32>,
    return
  }
  func.func @transform_0(%arg0: i32) -> (i32, i32) {
    %c0_i32 = arith.constant 0 : i32
    %c0_i32_0 = arith.constant 0 : i32
    return %arg0, %c0_i32 : i32, i32
  }
  func.func @transform_1(%arg0: i32) -> (i32, i32) {
    %c0_i32 = arith.constant 0 : i32
    %c0_i32_0 = arith.constant 0 : i32
    %c0_i32_1 = arith.constant 0 : i32
    return %c0_i32, %c0_i32_0 : i32, i32
  }
  func.func @transform_2(%arg0: i32) -> (i32, i32) {
    %c0_i32 = arith.constant 0 : i32
    %c0_i32_0 = arith.constant 0 : i32
    %c0_i32_1 = arith.constant 0 : i32
    return %c0_i32, %c0_i32_0 : i32, i32
  }
  func.func @transform_3(%arg0: i32) -> (i32, i32) {
    %c0_i32 = arith.constant 0 : i32
    %c0_i32_0 = arith.constant 0 : i32
    %c0_i32_1 = arith.constant 0 : i32
    return %c0_i32, %c0_i32_0 : i32, i32
  }
  func.func @transform_4(%arg0: i32) -> (i32, i32) {
    %c0_i32 = arith.constant 0 : i32
    %c0_i32_0 = arith.constant 0 : i32
    return %arg0, %c0_i32 : i32, i32
  }
}

</mosaic_0001>

<bundles_post_ra>
// kernel: tpu_custom_call.1
= control target key start
LH: loop header
LB: loop body
LE: loop exit
PB: predicated region body
PF: predicated region fallthrough
CT: control target
= control target key end

     0   :  { %9 = vsyncpa [#allocation3], 0  ;;  %s2888_s0 = inlined_call_operand.hbm [shape: f32[8,128], index: 0, kind: input, shape index: {}]   ;;  %s2889_s1 = inlined_call_operand.hbm [shape: f32[128,128], index: 1, kind: input, shape index: {}]   ;;  %s2890_s2 = inlined_call_operand.vmem [shape: f32[1,128], index: 2, kind: input, shape index: {}]   ;;  %s2891_s3 = inlined_call_operand.hbm [shape: f32[128,128], index: 3, kind: input, shape index: {}]   ;;  %s2892_s4 = inlined_call_operand.hbm [shape: f32[8,128], index: 4, kind: output, shape index: {}]  }
   0x1   :  { %10 = vsyncpa [#allocation6], 0 }
   0x2   :  { %11 = vsyncpa [#allocation4], 0  ;;  %s2118_s15 = smov [#allocation5]  }
   0x3   :  { %s27_s16 = sshll.u32 %s2118_s15, 4  ;;  %s28_s16 = int_to_ptr.vmem [resolvable:$true] %s27_s16 }
   0x4   :  { %s2040_s17 = scalar_lea.vmem %s28_s16, 2048  ;;  %p2045_p1 = scmp.lt.s32.totalorder %s28_s16, %s28_s16 }
   0x5   :  { %p2041_p0 = scmp.ne.s32.totalorder %s28_s16, %s2040_s17  ;;  %p2046_p2 = scmp.lt.s32.totalorder %s2040_s17, %s2040_s17 }
   0x7   :  { %p2047_p3 = por %p2046_p2, %p2045_p1 }
   0x9   :  { %p2048_p4 = pnand %p2047_p3, %p2041_p0 }
   0xb   :  { %2051 = shalt.err (!%p2048_p4)
}
   0xc   :  { %s2119_s18 = smov 128   ;;  %s2120_s19 = smov 8  }
   0xd   :  { %33 = dma.hbm_to_vmem [thread:$0]  %s2889_s1, 2048, %s28_s16, [#allocation6], %s2119_s18, %s2119_s18, %s2120_s19  }
   0xe   :  { %s2121_s22 = smov [#allocation2]   ;;  %s2122_s24 = smov [#allocation7]  }
   0xf   :  { %s18_s23 = sshll.u32 %s2121_s22, 4  ;;  %s41_s25 = sshll.u32 %s2122_s24, 4  ;;  %s19_s23 = int_to_ptr.vmem [resolvable:$true] %s18_s23  ;;  %s42_s25 = int_to_ptr.vmem [resolvable:$true] %s41_s25 }
  0x10   :  { %s2060_s26 = scalar_lea.vmem %s19_s23, 128  ;;  %p2065_p6 = scmp.lt.s32.totalorder %s19_s23, %s19_s23 }
  0x11   :  { %p2061_p5 = scmp.ne.s32.totalorder %s19_s23, %s2060_s26  ;;  %p2066_p7 = scmp.lt.s32.totalorder %s2060_s26, %s2060_s26 }
  0x13   :  { %p2067_p8 = por %p2066_p7, %p2065_p6 }
  0x15   :  { %p2068_p9 = pnand %p2067_p8, %p2061_p5 }
  0x17   :  { %2071 = shalt.err (!%p2068_p9)
}
  0x18   :  { %21 = dma.hbm_to_vmem [thread:$0]  %s2888_s0, 128, %s19_s23, [#allocation3]  }
  0x19   :  { %s2080_s29 = scalar_lea.vmem %s42_s25, 2048  ;;  %p2085_p11 = scmp.lt.s32.totalorder %s42_s25, %s42_s25 }
  0x1a   :  { %p2081_p10 = scmp.ne.s32.totalorder %s42_s25, %s2080_s29  ;;  %p2086_p12 = scmp.lt.s32.totalorder %s2080_s29, %s2080_s29 }
  0x1c   :  { %p2087_p13 = por %p2086_p12, %p2085_p11 }
  0x1e   :  { %p2088_p0 = pnand %p2087_p13, %p2081_p10 }
  0x20   :  { %2091 = shalt.err (!%p2088_p0)
}
  0x21   :  { %47 = dma.hbm_to_vmem [thread:$0]  %s2891_s3, 2048, %s42_s25, [#allocation6], %s2119_s18, %s2119_s18, %s2120_s19  }
  0x22   :  { %2112 = dma.done.wait [#allocation3], 128  }
  0x23   :  { %2113 = vsyncadd [#allocation3], 4294967168 }
  0x24   :  { %2114 = dma.done.wait [#allocation6], 4096  }
  0x25   :  { %2115 = vsyncadd [#allocation6], 4294963200  ;;  %v2123_v0 = vmov 0.0   ;;  %vm2124_vm0 = vmmov 0   ;;  %v73_v1 = vld [vmem:[#allocation5 + $0x78] sm:$0xff]  ;;  %v72_v2 = vld [vmem:[#allocation5 + $0x70] sm:$0xff] }
  0x26   :  { %1602 = vmatprep.subr.mxu0 %v2123_v0  ;;  %1637 = vmatprep.subr.mxu1 %v2123_v0  ;;  %v71_v3 = vld [vmem:[#allocation5 + $0x68] sm:$0xff]  ;;  %v2166_v4 = vand.u32 4294901760, %v73_v1  ;;  %v2168_v5 = vand.u32 4294901760, %v72_v2  ;;  %v70_v7 = vld [vmem:[#allocation5 + $0x60] sm:$0xff]  ;;  %v69_v8 = vld [vmem:[#allocation5 + $0x58] sm:$0xff] }
  0x27   :  { %1634 = vmatprep.mubr.msk.f32.mxu0 %vm2124_vm0, %v2123_v0  ;;  %1669 = vmatprep.mubr.msk.f32.mxu1 %vm2124_vm0, %v2123_v0  ;;  %v2170_v6 = vand.u32 4294901760, %v71_v3  ;;  %v68_v9 = vld [vmem:[#allocation5 + $0x50] sm:$0xff]  ;;  %v2172_v10 = vand.u32 4294901760, %v70_v7  ;;  %v2174_v11 = vand.u32 4294901760, %v69_v8  ;;  %v67_v13 = vld [vmem:[#allocation5 + $0x48] sm:$0xff]  ;;  %v66_v14 = vld [vmem:[#allocation5 + $0x40] sm:$0xff] }
  0x28   :  { %v2176_v12 = vand.u32 4294901760, %v68_v9  ;;  %1603 = vmatpush3.msra.mxu0 %v2166_v4  ;;  %v2180_v15 = vsub.f32 %v73_v1, %v2166_v4  ;;  %v2183_v16 = vsub.f32 %v72_v2, %v2168_v5  ;;  %v2185_v17 = vand.u32 4294901760, %v67_v13  ;;  %v65_v19 = vld [vmem:[#allocation5 + $0x38] sm:$0xff]  ;;  %v64_v26 = vld [vmem:[#allocation5 + $0x30] sm:$0xff]  ;;  %v63_v36 = vld [vmem:[#allocation5 + $0x28] sm:$0xff] }
  0x29   :  { %v2188_v18 = vsub.f32 %v71_v3, %v2170_v6  ;;  %1604 = vmatprep.subr.mxu0 %v2123_v0  ;;  %v2192_v20 = vsub.f32 %v70_v7, %v2172_v10  ;;  %v2195_v21 = vsub.f32 %v69_v8, %v2174_v11  ;;  %v2201_v25 = vand.u32 4294901760, %v66_v14  ;;  %v62_v41 = vld [vmem:[#allocation5 + $0x20] sm:$0xff]  ;;  %v61_v49 = vld [vmem:[#allocation5 + $0x18] sm:$0xff]  ;;  %v60_v54 = vld [vmem:[#allocation5 + $0x10] sm:$0xff] }
  0x2a   :  { %1605 = vmatpush3.msra.mxu0 %v2168_v5  ;;  %v175_v22 = vand.u32 4294901760, %v2180_v15  ;;  %v182_v23 = vand.u32 4294901760, %v2183_v16  ;;  %v2205_v28 = vand.u32 4294901760, %v65_v19  ;;  %v2209_v30 = vsub.f32 %v68_v9, %v2176_v12  ;;  %v57_v50 = vld [vmem:[#allocation2] sm:$0xff]  ;;  %v59_v60 = vld [vmem:[#allocation5 + $0x8] sm:$0xff]  ;;  %v58_v7 = vld [vmem:[#allocation5] sm:$0xff] }
  0x2b   :  { %v189_v24 = vand.u32 4294901760, %v2188_v18  ;;  %1606 = vmatprep.subr.mxu0 %v2123_v0  ;;  %v196_v27 = vand.u32 4294901760, %v2192_v20  ;;  %v203_v29 = vand.u32 4294901760, %v2195_v21  ;;  %v2222_v34 = vsub.f32 %v67_v13, %v2185_v17 }
  0x2c   :  { %1607 = vmatpush3.msra.mxu0 %v2170_v6  ;;  %v176_v31 = vsub.f32 %v2180_v15, %v175_v22  ;;  %v183_v32 = vsub.f32 %v2183_v16, %v182_v23  ;;  %v2225_v35 = vand.u32 4294901760, %v64_v26  ;;  %v210_v40 = vand.u32 4294901760, %v2209_v30 }
  0x2d   :  { %v190_v33 = vsub.f32 %v2188_v18, %v189_v24  ;;  %1608 = vmatprep.subr.mxu0 %v2123_v0  ;;  %v197_v39 = vsub.f32 %v2192_v20, %v196_v27  ;;  %v204_v42 = vsub.f32 %v2195_v21, %v203_v29  ;;  %v2237_v43 = vsub.f32 %v66_v14, %v2201_v25 }
  0x2e   :  { %1609 = vmatpush3.msra.mxu0 %v2172_v10  ;;  %v177_v37 = vand.u32 4294901760, %v176_v31  ;;  %v184_v38 = vand.u32 4294901760, %v183_v32  ;;  %v2240_v45 = vand.u32 4294901760, %v63_v36  ;;  %v217_v46 = vand.u32 4294901760, %v2222_v34 }
  0x2f   :  { %1610 = vmatprep.subr.mxu0 %v2123_v0  ;;  %v191_v44 = vand.u32 4294901760, %v190_v33  ;;  %v2244_v47 = vsub.f32 %v65_v19, %v2205_v28  ;;  %v2248_v48 = vand.u32 4294901760, %v62_v41  ;;  %v198_v51 = vand.u32 4294901760, %v197_v39 }
  0x30   :  { %1611 = vmatpush3.msra.mxu0 %v2174_v11  ;;  %1638 = vmatpush3.msra.mxu1 %v177_v37  ;;  %v211_v52 = vsub.f32 %v2209_v30, %v210_v40  ;;  %v224_v53 = vand.u32 4294901760, %v2237_v43  ;;  %v2256_v55 = vsub.f32 %v64_v26, %v2225_v35  ;;  %v205_v56 = vand.u32 4294901760, %v204_v42 }
  0x31   :  { %1612 = vmatprep.subr.mxu0 %v2123_v0  ;;  %1639 = vmatprep.subr.mxu1 %v2123_v0  ;;  %v231_v57 = vand.u32 4294901760, %v2244_v47  ;;  %v218_v58 = vsub.f32 %v2222_v34, %v217_v46  ;;  %v2265_v59 = vand.u32 4294901760, %v61_v49  ;;  %v2268_v61 = vsub.f32 %v63_v36, %v2240_v45 }
  0x32   :  { %1613 = vmatpush3.msra.mxu0 %v2176_v12  ;;  %1640 = vmatpush3.msra.mxu1 %v184_v38  ;;  %v2270_v62 = vand.u32 4294901760, %v57_v50  ;;  %v2274_v63 = vand.u32 4294901760, %v60_v54  ;;  %v212_v1 = vand.u32 4294901760, %v211_v52  ;;  %v225_v2 = vsub.f32 %v2237_v43, %v224_v53 }
  0x33   :  { %1614 = vmatprep.subr.mxu0 %v2123_v0  ;;  %1641 = vmatprep.subr.mxu1 %v2123_v0  ;;  %v238_v3 = vand.u32 4294901760, %v2256_v55  ;;  %v2282_v8 = vsub.f32 %v62_v41, %v2248_v48  ;;  %v232_v9 = vsub.f32 %v2244_v47, %v231_v57  ;;  %v2289_v13 = vand.u32 4294901760, %v59_v60 }
  0x34   :  { %1615 = vmatpush3.msra.mxu0 %v2185_v17  ;;  %1642 = vmatpush3.msra.mxu1 %v191_v44  ;;  %v219_v14 = vand.u32 4294901760, %v218_v58  ;;  %v245_v19 = vand.u32 4294901760, %v2268_v61  ;;  %v2294_v26 = vsub.f32 %v57_v50, %v2270_v62  ;;  %v2297_v31 = vsub.f32 %v61_v49, %v2265_v59 }
  0x35   :  { %1616 = vmatprep.subr.mxu0 %v2123_v0  ;;  %1643 = vmatprep.subr.mxu1 %v2123_v0  ;;  %v2301_v32 = vand.u32 4294901760, %v58_v7  ;;  %v226_v33 = vand.u32 4294901760, %v225_v2  ;;  %v239_v36 = vsub.f32 %v2256_v55, %v238_v3  ;;  %v252_v37 = vand.u32 4294901760, %v2282_v8 }
  0x36   :  { %1617 = vmatpush3.msra.mxu0 %v2201_v25  ;;  %1644 = vmatpush3.msra.mxu1 %v198_v51  ;;  %v2309_v38 = vsub.f32 %v60_v54, %v2274_v63  ;;  %v233_v39 = vand.u32 4294901760, %v232_v9  ;;  %v246_v41 = vsub.f32 %v2268_v61, %v245_v19  ;;  %v164_v42 = vand.u32 4294901760, %v2294_v26 }
  0x37   :  { %1618 = vmatprep.subr.mxu0 %v2123_v0  ;;  %1645 = vmatprep.subr.mxu1 %v2123_v0  ;;  %v259_v44 = vand.u32 4294901760, %v2297_v31  ;;  %v2320_v49 = vsub.f32 %v59_v60, %v2289_v13  ;;  %v240_v50 = vand.u32 4294901760, %v239_v36  ;;  %v253_v51 = vsub.f32 %v2282_v8, %v252_v37 }
  0x38   :  { %1619 = vmatpush3.msra.mxu0 %v2205_v28  ;;  %1646 = vmatpush3.msra.mxu1 %v205_v56  ;;  %v266_v52 = vand.u32 4294901760, %v2309_v38  ;;  %v2330_v54 = vsub.f32 %v58_v7, %v2301_v32  ;;  %v247_v56 = vand.u32 4294901760, %v246_v41  ;;  %v165_v58 = vsub.f32 %v2294_v26, %v164_v42 }
  0x39   :  { %1620 = vmatprep.subr.mxu0 %v2123_v0  ;;  %1647 = vmatprep.subr.mxu1 %v2123_v0  ;;  %v260_v60 = vsub.f32 %v2297_v31, %v259_v44  ;;  %v254_v2 = vand.u32 4294901760, %v253_v51 }
  0x3a   :  { %1621 = vmatpush3.msra.mxu0 %v2225_v35  ;;  %1648 = vmatpush3.msra.mxu1 %v212_v1  ;;  %v273_v1 = vand.u32 4294901760, %v2320_v49  ;;  %v267_v7 = vsub.f32 %v2309_v38, %v266_v52  ;;  %v280_v9 = vand.u32 4294901760, %v2330_v54 }
  0x3b   :  { %1622 = vmatprep.subr.mxu0 %v2123_v0  ;;  %1649 = vmatprep.subr.mxu1 %v2123_v0 }
  0x3c   :  { %1623 = vmatpush3.msra.mxu0 %v2240_v45  ;;  %1650 = vmatpush3.msra.mxu1 %v219_v14  ;;  %v166_v14 = vand.u32 4294901760, %v165_v58  ;;  %v274_v36 = vsub.f32 %v2320_v49, %v273_v1  ;;  %v281_v41 = vsub.f32 %v2330_v54, %v280_v9  ;;  %v728_v58 = vld [vmem:[#allocation7 + $0x28] sm:$0xff] }
  0x3d   :  { %1624 = vmatprep.subr.mxu0 %v2123_v0  ;;  %1651 = vmatprep.subr.mxu1 %v2123_v0 }
  0x3e   :  { %1625 = vmatpush3.msra.mxu0 %v2248_v48  ;;  %1652 = vmatpush3.msra.mxu1 %v226_v33  ;;  %v261_v33 = vand.u32 4294901760, %v260_v60  ;;  %v282_v51 = vand.u32 4294901760, %v281_v41 }
  0x3f   :  { %1626 = vmatprep.subr.mxu0 %v2123_v0  ;;  %1653 = vmatprep.subr.mxu1 %v2123_v0 }
  0x40   :  { %1627 = vmatpush3.msra.mxu0 %v2265_v59  ;;  %1654 = vmatpush3.msra.mxu1 %v233_v39  ;;  %v268_v39 = vand.u32 4294901760, %v267_v7  ;;  %v2631_v7 = vand.u32 4294901760, %v728_v58 }
  0x41   :  { %1628 = vmatprep.subr.mxu0 %v2123_v0  ;;  %1655 = vmatprep.subr.mxu1 %v2123_v0 }
  0x42   :  { %1629 = vmatpush3.msra.mxu0 %v2274_v63  ;;  %1656 = vmatpush3.msra.mxu1 %v240_v50  ;;  %v275_v50 = vand.u32 4294901760, %v274_v36 }
  0x43   :  { %1630 = vmatprep.subr.mxu0 %v2123_v0  ;;  %1657 = vmatprep.subr.mxu1 %v2123_v0 }
  0x44   :  { %1631 = vmatpush3.msra.mxu0 %v2289_v13  ;;  %1658 = vmatpush3.msra.mxu1 %v247_v56 }
  0x45   :  { %1632 = vmatprep.subr.mxu0 %v2123_v0  ;;  %1659 = vmatprep.subr.mxu1 %v2123_v0 }
  0x46   :  { %1633 = vmatpush3.msra.mxu0 %v2301_v32  ;;  %1660 = vmatpush3.msra.mxu1 %v254_v2 }
  0x47   :  { %1661 = vmatprep.subr.mxu1 %v2123_v0  ;;  %1672 = vmatprep.subr.mxu0 %v2123_v0 }
  0x48   :  { %1635 = vmatmul.mubr.f32.vlgmr.msra.gmra.mxu0 %v166_v14  ;;  %1662 = vmatpush3.msra.mxu1 %v261_v33  ;;  %v727_v14 = vld [vmem:[#allocation7 + $0x20] sm:$0xff] }
  0x49   :  { %1673 = vmatpush3.msra.mxu0 %v2180_v15  ;;  %1663 = vmatprep.subr.mxu1 %v2123_v0  ;;  %v2646_v41 = vand.u32 4294901760, %v727_v14 }
  0x4a   :  { %1674 = vmatprep.subr.mxu0 %v2123_v0  ;;  %1664 = vmatpush3.msra.mxu1 %v268_v39  ;;  %v2644_v39 = vsub.f32 %v728_v58, %v2631_v7 }
  0x4b   :  { %1675 = vmatpush3.msra.mxu0 %v2183_v16  ;;  %1665 = vmatprep.subr.mxu1 %v2123_v0 }
  0x4c   :  { %1676 = vmatprep.subr.mxu0 %v2123_v0  ;;  %1666 = vmatpush3.msra.mxu1 %v275_v50 }
  0x4d   :  { %1677 = vmatpush3.msra.mxu0 %v2188_v18  ;;  %1667 = vmatprep.subr.mxu1 %v2123_v0 }
  0x4e   :  { %1678 = vmatprep.subr.mxu0 %v2123_v0  ;;  %1668 = vmatpush3.msra.mxu1 %v282_v51  ;;  %v726_v51 = vld [vmem:[#allocation7 + $0x18] sm:$0xff] }
  0x4f   :  { %1679 = vmatpush3.msra.mxu0 %v2192_v20  ;;  %1670 = vmatmul.mubr.f32.vlgmr.msra.gmra.mxu1 %v2270_v62 }
  0x50   :  { %1680 = vmatprep.subr.mxu0 %v2123_v0  ;;  %1707 = vmatprep.subr.mxu1 %v2123_v0 }
  0x51   :  { %1681 = vmatpush3.msra.mxu0 %v2195_v21  ;;  %1708 = vmatpush3.msra.mxu1 %v2166_v4 }
  0x52   :  { %1682 = vmatprep.subr.mxu0 %v2123_v0  ;;  %1709 = vmatprep.subr.mxu1 %v2123_v0 }
  0x53   :  { %1683 = vmatpush3.msra.mxu0 %v2209_v30  ;;  %1710 = vmatpush3.msra.mxu1 %v2168_v5 }
  0x54   :  { %1684 = vmatprep.subr.mxu0 %v2123_v0  ;;  %1711 = vmatprep.subr.mxu1 %v2123_v0 }
  0x55   :  { %1685 = vmatpush3.msra.mxu0 %v2222_v34  ;;  %1712 = vmatpush3.msra.mxu1 %v2170_v6  ;;  %v734_v34 = vld [vmem:[#allocation7 + $0x58] sm:$0xff] }
  0x56   :  { %1686 = vmatprep.subr.mxu0 %v2123_v0  ;;  %1713 = vmatprep.subr.mxu1 %v2123_v0 }
  0x57   :  { %1687 = vmatpush3.msra.mxu0 %v2237_v43  ;;  %1714 = vmatpush3.msra.mxu1 %v2172_v10  ;;  %v733_v43 = vld [vmem:[#allocation7 + $0x50] sm:$0xff] }
  0x58   :  { %1688 = vmatprep.subr.mxu0 %v2123_v0  ;;  %1715 = vmatprep.subr.mxu1 %v2123_v0 }
  0x59   :  { %1689 = vmatpush3.msra.mxu0 %v2244_v47  ;;  %1716 = vmatpush3.msra.mxu1 %v2174_v11  ;;  %v2578_v47 = vand.u32 4294901760, %v733_v43 }
  0x5a   :  { %1690 = vmatprep.subr.mxu0 %v2123_v0  ;;  %1717 = vmatprep.subr.mxu1 %v2123_v0 }
  0x5b   :  { %1691 = vmatpush3.msra.mxu0 %v2256_v55  ;;  %1718 = vmatpush3.msra.mxu1 %v2176_v12 }
  0x5c   :  { %1692 = vmatprep.subr.mxu0 %v2123_v0  ;;  %1719 = vmatprep.subr.mxu1 %v2123_v0 }
  0x5d   :  { %1693 = vmatpush3.msra.mxu0 %v2268_v61  ;;  %1720 = vmatpush3.msra.mxu1 %v2185_v17  ;;  %v731_v61 = vld [vmem:[#allocation7 + $0x40] sm:$0xff] }
  0x5e   :  { %1694 = vmatprep.subr.mxu0 %v2123_v0  ;;  %1721 = vmatprep.subr.mxu1 %v2123_v0 }
  0x5f   :  { %1695 = vmatpush3.msra.mxu0 %v2282_v8  ;;  %1722 = vmatpush3.msra.mxu1 %v2201_v25 }
  0x60   :  { %1696 = vmatprep.subr.mxu0 %v2123_v0  ;;  %1723 = vmatprep.subr.mxu1 %v2123_v0 }
  0x61   :  { %1697 = vmatpush3.msra.mxu0 %v2297_v31  ;;  %1724 = vmatpush3.msra.mxu1 %v2205_v28 }
  0x62   :  { %1698 = vmatprep.subr.mxu0 %v2123_v0  ;;  %1725 = vmatprep.subr.mxu1 %v2123_v0 }
  0x63   :  { %1699 = vmatpush3.msra.mxu0 %v2309_v38  ;;  %1726 = vmatpush3.msra.mxu1 %v2225_v35 }
  0x64   :  { %1700 = vmatprep.subr.mxu0 %v2123_v0  ;;  %1727 = vmatprep.subr.mxu1 %v2123_v0 }
  0x65   :  { %1701 = vmatpush3.msra.mxu0 %v2320_v49  ;;  %1728 = vmatpush3.msra.mxu1 %v2240_v45 }
  0x66   :  { %1702 = vmatprep.subr.mxu0 %v2123_v0  ;;  %1729 = vmatprep.subr.mxu1 %v2123_v0 }
  0x67   :  { %1703 = vmatpush3.msra.mxu0 %v2330_v54  ;;  %1704 = vmatprep.mubr.msk.f32.mxu0 %vm2124_vm0, %v2123_v0 }
  0x68   :  { %1730 = vmatpush3.msra.mxu1 %v2248_v48  ;;  %1705 = vmatmul.mubr.f32.vlgmr.msra.gmra.mxu0 %v2294_v26 }
  0x69   :  { %1731 = vmatprep.subr.mxu1 %v2123_v0  ;;  %1742 = vmatprep.subr.mxu0 %v2123_v0 }
  0x6a   :  { %1732 = vmatpush3.msra.mxu1 %v2265_v59  ;;  %1743 = vmatpush3.msra.mxu0 %v175_v22 }
  0x6b   :  { %1733 = vmatprep.subr.mxu1 %v2123_v0  ;;  %1744 = vmatprep.subr.mxu0 %v2123_v0 }
  0x6c   :  { %1734 = vmatpush3.msra.mxu1 %v2274_v63  ;;  %1745 = vmatpush3.msra.mxu0 %v182_v23 }
  0x6d   :  { %1735 = vmatprep.subr.mxu1 %v2123_v0  ;;  %1746 = vmatprep.subr.mxu0 %v2123_v0 }
  0x6e   :  { %1736 = vmatpush3.msra.mxu1 %v2289_v13  ;;  %1747 = vmatpush3.msra.mxu0 %v189_v24 }
  0x6f   :  { %1737 = vmatprep.subr.mxu1 %v2123_v0  ;;  %1748 = vmatprep.subr.mxu0 %v2123_v0 }
  0x70   :  { %1738 = vmatpush3.msra.mxu1 %v2301_v32  ;;  %1739 = vmatprep.mubr.msk.f32.mxu1 %vm2124_vm0, %v2123_v0 }
  0x71   :  { %1749 = vmatpush3.msra.mxu0 %v196_v27  ;;  %1740 = vmatmul.mubr.f32.vlgmr.msra.gmra.mxu1 %v164_v42  ;;  %v729_v42 = vld [vmem:[#allocation7 + $0x30] sm:$0xff] }
  0x72   :  { %1750 = vmatprep.subr.mxu0 %v2123_v0  ;;  %1777 = vmatprep.subr.mxu1 %v2123_v0  ;;  %v2621_v54 = vand.u32 4294901760, %v729_v42 }
  0x73   :  { %1751 = vmatpush3.msra.mxu0 %v203_v29  ;;  %1778 = vmatpush3.msra.mxu1 %v2166_v4  ;;  %v738_v4 = vld [vmem:[#allocation7 + $0x78] sm:$0xff]  ;;  %v735_v29 = vld [vmem:[#allocation7 + $0x60] sm:$0xff] }
  0x74   :  { %1752 = vmatprep.subr.mxu0 %v2123_v0  ;;  %1779 = vmatprep.subr.mxu1 %v2123_v0  ;;  %v2564_v30 = vand.u32 4294901760, %v735_v29  ;;  %v2629_v2 = vsub.f32 %v729_v42, %v2621_v54 }
  0x75   :  { %1753 = vmatpush3.msra.mxu0 %v210_v40  ;;  %1780 = vmatpush3.msra.mxu1 %v2168_v5  ;;  %v737_v5 = vld [vmem:[#allocation7 + $0x70] sm:$0xff]  ;;  %v2570_v40 = vand.u32 4294901760, %v734_v34 }
  0x76   :  { %1754 = vmatprep.subr.mxu0 %v2123_v0  ;;  %1781 = vmatprep.subr.mxu1 %v2123_v0  ;;  %v896_v36 = vand.u32 4294901760, %v2629_v2 }
  0x77   :  { %1755 = vmatpush3.msra.mxu0 %v217_v46  ;;  %1782 = vmatpush3.msra.mxu1 %v2170_v6  ;;  %v736_v6 = vld [vmem:[#allocation7 + $0x68] sm:$0xff]  ;;  %v2576_v46 = vsub.f32 %v734_v34, %v2570_v40 }
  0x78   :  { %1756 = vmatprep.subr.mxu0 %v2123_v0  ;;  %1783 = vmatprep.subr.mxu1 %v2123_v0  ;;  %v724_v34 = vld [vmem:[#allocation7 + $0x8] sm:$0xff] }
  0x79   :  { %1757 = vmatpush3.msra.mxu0 %v224_v53  ;;  %1784 = vmatpush3.msra.mxu1 %v2172_v10  ;;  %v2529_v10 = vand.u32 4294901760, %v738_v4  ;;  %v861_v55 = vand.u32 4294901760, %v2576_v46 }
  0x7a   :  { %1758 = vmatprep.subr.mxu0 %v2123_v0  ;;  %1785 = vmatprep.subr.mxu1 %v2123_v0 }
  0x7b   :  { %1759 = vmatpush3.msra.mxu0 %v231_v57  ;;  %1786 = vmatpush3.msra.mxu1 %v2174_v11  ;;  %v2531_v11 = vand.u32 4294901760, %v737_v5  ;;  %v2536_v15 = vsub.f32 %v738_v4, %v2529_v10  ;;  %v2587_v57 = vsub.f32 %v733_v43, %v2578_v47  ;;  %v723_v43 = vld [vmem:[#allocation7] sm:$0xff] }
  0x7c   :  { %1760 = vmatprep.subr.mxu0 %v2123_v0  ;;  %1787 = vmatprep.subr.mxu1 %v2123_v0 }
  0x7d   :  { %1761 = vmatpush3.msra.mxu0 %v238_v3  ;;  %1788 = vmatpush3.msra.mxu1 %v2176_v12  ;;  %v2533_v12 = vand.u32 4294901760, %v736_v6  ;;  %v2539_v16 = vsub.f32 %v737_v5, %v2531_v11  ;;  %v833_v18 = vand.u32 4294901760, %v2536_v15  ;;  %v868_v3 = vand.u32 4294901760, %v2587_v57 }
  0x7e   :  { %1762 = vmatprep.subr.mxu0 %v2123_v0  ;;  %1789 = vmatprep.subr.mxu1 %v2123_v0  ;;  %v897_v5 = vsub.f32 %v2629_v2, %v896_v36 }
  0x7f   :  { %1763 = vmatpush3.msra.mxu0 %v245_v19  ;;  %1790 = vmatpush3.msra.mxu1 %v2185_v17  ;;  %v2542_v17 = vsub.f32 %v736_v6, %v2533_v12  ;;  %v840_v20 = vand.u32 4294901760, %v2539_v16  ;;  %v834_v22 = vsub.f32 %v2536_v15, %v833_v18  ;;  %v730_v19 = vld [vmem:[#allocation7 + $0x38] sm:$0xff]  ;;  %v869_v31 = vsub.f32 %v2587_v57, %v868_v3 }
  0x80   :  { %1764 = vmatprep.subr.mxu0 %v2123_v0  ;;  %1791 = vmatprep.subr.mxu1 %v2123_v0  ;;  %v903_v6 = vand.u32 4294901760, %v2644_v39 }
  0x81   :  { %1765 = vmatpush3.msra.mxu0 %v252_v37  ;;  %1792 = vmatpush3.msra.mxu1 %v2201_v25  ;;  %v847_v21 = vand.u32 4294901760, %v2542_v17  ;;  %v841_v23 = vsub.f32 %v2539_v16, %v840_v20  ;;  %v835_v25 = vand.u32 4294901760, %v834_v22  ;;  %v2608_v37 = vand.u32 4294901760, %v730_v19 }
  0x82   :  { %1766 = vmatprep.subr.mxu0 %v2123_v0  ;;  %1793 = vmatprep.subr.mxu1 %v2123_v0  ;;  %v2656_v22 = vsub.f32 %v727_v14, %v2646_v41 }
  0x83   :  { %1767 = vmatpush3.msra.mxu0 %v259_v44  ;;  %1794 = vmatpush3.msra.mxu1 %v2205_v28  ;;  %v848_v24 = vsub.f32 %v2542_v17, %v847_v21  ;;  %v842_v27 = vand.u32 4294901760, %v841_v23  ;;  %v870_v44 = vand.u32 4294901760, %v869_v31  ;;  %v2659_v23 = vand.u32 4294901760, %v726_v51 }
  0x84   :  { %1768 = vmatprep.subr.mxu0 %v2123_v0  ;;  %1795 = vmatprep.subr.mxu1 %v2123_v0 }
  0x85   :  { %1769 = vmatpush3.msra.mxu0 %v266_v52  ;;  %1796 = vmatpush3.msra.mxu1 %v2225_v35  ;;  %v849_v28 = vand.u32 4294901760, %v848_v24  ;;  %v2568_v35 = vsub.f32 %v735_v29, %v2564_v30  ;;  %v2619_v52 = vsub.f32 %v730_v19, %v2608_v37  ;;  %v725_v24 = vld [vmem:[#allocation7 + $0x10] sm:$0xff] }
  0x86   :  { %1770 = vmatprep.subr.mxu0 %v2123_v0  ;;  %1797 = vmatprep.subr.mxu1 %v2123_v0  ;;  %v2667_v29 = vand.u32 4294901760, %v725_v24 }
  0x87   :  { %1771 = vmatpush3.msra.mxu0 %v273_v1  ;;  %1798 = vmatpush3.msra.mxu1 %v2240_v45  ;;  %v854_v45 = vand.u32 4294901760, %v2568_v35  ;;  %v889_v1 = vand.u32 4294901760, %v2619_v52 }
  0x88   :  { %1772 = vmatprep.subr.mxu0 %v2123_v0  ;;  %1799 = vmatprep.subr.mxu1 %v2123_v0  ;;  %v2683_v19 = vsub.f32 %v725_v24, %v2667_v29 }
  0x89   :  { %1773 = vmatpush3.msra.mxu0 %v280_v9  ;;  %1774 = vmatprep.mubr.msk.f32.mxu0 %vm2124_vm0, %v2123_v0  ;;  %v855_v53 = vsub.f32 %v2568_v35, %v854_v45  ;;  %v890_v33 = vsub.f32 %v2619_v52, %v889_v1 }
  0x8a   :  { %1800 = vmatpush3.msra.mxu1 %v2248_v48  ;;  %1775 = vmatmul.mubr.f32.vlgmr.msra.gmra.mxu0 %v2270_v62  ;;  %v732_v48 = vld [vmem:[#allocation7 + $0x48] sm:$0xff] }
  0x8b   :  { %1801 = vmatprep.subr.mxu1 %v2123_v0  ;;  %1809 = vmatprep.mubr.msk.f32.mxu1 %vm2124_vm0, %v2123_v0  ;;  %v891_v4 = vand.u32 4294901760, %v890_v33 }
  0x8c   :  { %1802 = vmatpush3.msra.mxu1 %v2265_v59  ;;  %1812 = vmatprep.subr.mxu0 %v2123_v0  ;;  %v2589_v59 = vand.u32 4294901760, %v732_v48 }
  0x8d   :  { %1803 = vmatprep.subr.mxu1 %v2123_v0  ;;  %1844 = vmatprep.mubr.msk.f32.mxu0 %vm2124_vm0, %v2123_v0 }
  0x8e   :  { %1804 = vmatpush3.msra.mxu1 %v2274_v63  ;;  %1813 = vmatpush3.msra.mxu0 %v2529_v10  ;;  %v862_v63 = vsub.f32 %v2576_v46, %v861_v55  ;;  %v2598_v8 = vsub.f32 %v732_v48, %v2589_v59  ;;  %v2671_v48 = vsub.f32 %v726_v51, %v2659_v23 }
  0x8f   :  { %1805 = vmatprep.subr.mxu1 %v2123_v0  ;;  %1814 = vmatprep.subr.mxu0 %v2123_v0 }
  0x90   :  { %1806 = vmatpush3.msra.mxu1 %v2289_v13  ;;  %1815 = vmatpush3.msra.mxu0 %v2531_v11  ;;  %v2601_v13 = vand.u32 4294901760, %v731_v61  ;;  %v863_v26 = vand.u32 4294901760, %v862_v63 }
  0x91   :  { %1807 = vmatprep.subr.mxu1 %v2123_v0  ;;  %1816 = vmatprep.subr.mxu0 %v2123_v0 }
  0x92   :  { %1808 = vmatpush3.msra.mxu1 %v2301_v32  ;;  %1817 = vmatpush3.msra.mxu0 %v2533_v12  ;;  %v875_v32 = vand.u32 4294901760, %v2598_v8  ;;  %v2612_v38 = vsub.f32 %v731_v61, %v2601_v13  ;;  %v2675_v61 = vand.u32 4294901760, %v723_v43 }
  0x93   :  { %1810 = vmatmul.mubr.f32.vlgmr.msra.gmra.mxu1 %v2270_v62  ;;  %1847 = vmatprep.subr.mxu1 %v2123_v0  ;;  %v856_v62 = vand.u32 4294901760, %v855_v53  ;;  %v2673_v53 = vand.u32 4294901760, %v724_v34 }
  0x94   :  { %1879 = vmatprep.mubr.msk.f32.mxu1 %vm2124_vm0, %v2123_v0  ;;  %1818 = vmatprep.subr.mxu0 %v2123_v0  ;;  %v876_v49 = vsub.f32 %v2598_v8, %v875_v32  ;;  %v882_v56 = vand.u32 4294901760, %v2612_v38  ;;  %v2691_v42 = vsub.f32 %v723_v43, %v2675_v61 }
  0x95   :  { %1848 = vmatpush3.msra.mxu1 %v835_v25  ;;  %1819 = vmatpush3.msra.mxu0 %v2564_v30  ;;  %v898_v25 = vand.u32 4294901760, %v897_v5  ;;  %v2688_v31 = vsub.f32 %v724_v34, %v2673_v53 }
  0x96   :  { %1849 = vmatprep.subr.mxu1 %v2123_v0  ;;  %1820 = vmatprep.subr.mxu0 %v2123_v0  ;;  %v877_v60 = vand.u32 4294901760, %v876_v49  ;;  %v883_v9 = vsub.f32 %v2612_v38, %v882_v56  ;;  %v2895_v49 = vand.u32 4294901760, %v2683_v19 }
  0x97   :  { %1850 = vmatpush3.msra.mxu1 %v842_v27  ;;  %1821 = vmatpush3.msra.mxu0 %v2570_v40  ;;  %v904_v27 = vsub.f32 %v2644_v39, %v903_v6 }
  0x98   :  { %1851 = vmatprep.subr.mxu1 %v2123_v0  ;;  %1822 = vmatprep.subr.mxu0 %v2123_v0  ;;  %v884_v50 = vand.u32 4294901760, %v883_v9  ;;  %v2893_v9 = vand.u32 4294901760, %v2691_v42  ;;  %v925_v14 = vsub.f32 %v2683_v19, %v2895_v49 }
  0x99   :  { %1852 = vmatpush3.msra.mxu1 %v849_v28  ;;  %1823 = vmatpush3.msra.mxu0 %v2578_v47  ;;  %v910_v28 = vand.u32 4294901760, %v2656_v22 }
  0x9a   :  { %1853 = vmatprep.subr.mxu1 %v2123_v0  ;;  %1824 = vmatprep.subr.mxu0 %v2123_v0  ;;  %v939_v51 = vsub.f32 %v2691_v42, %v2893_v9 }
  0x9b   :  { %1825 = vmatpush3.msra.mxu0 %v2589_v59  ;;  %1854 = vmatpush3.msra.mxu1 %v856_v62  ;;  %v905_v62 = vand.u32 4294901760, %v904_v27  ;;  %v911_v63 = vsub.f32 %v2656_v22, %v910_v28 }
  0x9c   :  { %1826 = vmatprep.subr.mxu0 %v2123_v0  ;;  %1855 = vmatprep.subr.mxu1 %v2123_v0  ;;  %v940_v24 = vand.u32 4294901760, %v939_v51 }
  0x9d   :  { %1827 = vmatpush3.msra.mxu0 %v2601_v13  ;;  %1856 = vmatpush3.msra.mxu1 %v863_v26  ;;  %v2896_v26 = vand.u32 4294901760, %v2671_v48 }
  0x9e   :  { %1828 = vmatprep.subr.mxu0 %v2123_v0  ;;  %1857 = vmatprep.subr.mxu1 %v2123_v0 }
  0x9f   :  { %1829 = vmatpush3.msra.mxu0 %v2608_v37  ;;  %1858 = vmatpush3.msra.mxu1 %v870_v44  ;;  %v912_v44 = vand.u32 4294901760, %v911_v63  ;;  %v918_v58 = vsub.f32 %v2671_v48, %v2896_v26 }
  0xa0   :  { %1830 = vmatprep.subr.mxu0 %v2123_v0  ;;  %1859 = vmatprep.subr.mxu1 %v2123_v0 }
  0xa1   :  { %1831 = vmatpush3.msra.mxu0 %v2621_v54  ;;  %1860 = vmatpush3.msra.mxu1 %v877_v60  ;;  %v2894_v60 = vand.u32 4294901760, %v2688_v31  ;;  %v919_v33 = vand.u32 4294901760, %v918_v58 }
  0xa2   :  { %1832 = vmatprep.subr.mxu0 %v2123_v0  ;;  %1861 = vmatprep.subr.mxu1 %v2123_v0 }
  0xa3   :  { %1833 = vmatpush3.msra.mxu0 %v2631_v7  ;;  %1862 = vmatpush3.msra.mxu1 %v884_v50  ;;  %v932_v50 = vsub.f32 %v2688_v31, %v2894_v60 }
  0xa4   :  { %1834 = vmatprep.subr.mxu0 %v2123_v0  ;;  %1863 = vmatprep.subr.mxu1 %v2123_v0 }
  0xa5   :  { %1835 = vmatpush3.msra.mxu0 %v2646_v41  ;;  %1864 = vmatpush3.msra.mxu1 %v891_v4  ;;  %v926_v4 = vand.u32 4294901760, %v925_v14  ;;  %v933_v5 = vand.u32 4294901760, %v932_v50  ;;  %v1397_v14 = vld [vmem:[%s2890_s2] ss:$0 sm:$0xff]  ;;  %s2125_s2 = smov [#allocation8]  }
  0xa6   :  { %1836 = vmatprep.subr.mxu0 %v2123_v0  ;;  %1865 = vmatprep.subr.mxu1 %v2123_v0  ;;  %s1387_s5 = sshll.u32 %s2125_s2, 4  ;;  %s1388_s5 = int_to_ptr.vmem [resolvable:$true] %s1387_s5 }
  0xa7   :  { %1837 = vmatpush3.msra.mxu0 %v2659_v23  ;;  %1866 = vmatpush3.msra.mxu1 %v898_v25  ;;  %s2092_s6 = scalar_lea.vmem %s1388_s5, 128  ;;  %p2097_p2 = scmp.lt.s32.totalorder %s1388_s5, %s1388_s5 }
  0xa8   :  { %1838 = vmatprep.subr.mxu0 %v2123_v0  ;;  %1867 = vmatprep.subr.mxu1 %v2123_v0  ;;  %p2093_p1 = scmp.ne.s32.totalorder %s1388_s5, %s2092_s6  ;;  %p2098_p3 = scmp.lt.s32.totalorder %s2092_s6, %s2092_s6 }
  0xa9   :  { %1839 = vmatpush3.msra.mxu0 %v2667_v29  ;;  %1868 = vmatpush3.msra.mxu1 %v905_v62 }
  0xaa   :  { %1840 = vmatprep.subr.mxu0 %v2123_v0  ;;  %1869 = vmatprep.subr.mxu1 %v2123_v0  ;;  %p2099_p4 = por %p2098_p3, %p2097_p2 }
  0xab   :  { %1841 = vmatpush3.msra.mxu0 %v2673_v53  ;;  %1870 = vmatpush3.msra.mxu1 %v912_v44 }
  0xac   :  { %1842 = vmatprep.subr.mxu0 %v2123_v0  ;;  %1871 = vmatprep.subr.mxu1 %v2123_v0  ;;  %p2100_p5 = pnand %p2099_p4, %p2093_p1 }
  0xad   :  { %1843 = vmatpush3.msra.mxu0 %v2675_v61  ;;  %1872 = vmatpush3.msra.mxu1 %v919_v33 }
  0xae   :  { %1882 = vmatprep.subr.mxu0 %v2123_v0  ;;  %1873 = vmatprep.subr.mxu1 %v2123_v0 }
  0xaf   :  { %1874 = vmatpush3.msra.mxu1 %v926_v4 }
  0xb0   :  { %1875 = vmatprep.subr.mxu1 %v2123_v0 }
  0xb1   :  { %1876 = vmatpush3.msra.mxu1 %v933_v5 }
  0xb2   :  { %1877 = vmatprep.subr.mxu1 %v2123_v0 }
  0xb3   :  { %1878 = vmatpush3.msra.mxu1 %v940_v24 }
  0xb4   :  { %1917 = vmatprep.subr.mxu1 %v2123_v0 }
 0x108   :  { %v168_v25 = vpop.f32.mrf.mxu0 }
 0x109   :  { %v169_v33 = vadd.f32 %v1397_v14, %v168_v25 }
 0x10a   :  { %v1636_v27 = vpop.f32.mrf.mxu0 }
 0x10f   :  { %v319_v34 = vpop.f32.mrf.mxu1 }
 0x110   :  { %v320_v51 = vadd.f32 %v319_v34, %v169_v33 }
 0x111   :  { %v1671_v43 = vpop.f32.mrf.mxu1 }
 0x128   :  { %v423_v62 = vpop.f32.mrf.mxu0 }
 0x129   :  { %v424_v5 = vadd.f32 %v423_v62, %v320_v51 }
 0x12a   :  { %v1706_v63 = vpop.f32.mrf.mxu0 }
 0x131   :  { %v512_v44 = vpop.f32.mrf.mxu1 }
 0x132   :  { %v513_v24 = vadd.f32 %v512_v44, %v424_v5 }
 0x133   :  { %v1741_v58 = vpop.f32.mrf.mxu1 }
 0x14a   :  { %v631_v50 = vpop.f32.mrf.mxu0 }
 0x14b   :  { %v632_v9 = vadd.f32 %v631_v50, %v513_v24 }
 0x14c   :  { %v1776_v4 = vpop.f32.mrf.mxu0 }
 0x153   :  { %v718_v60 = vpop.f32.mrf.mxu1 }
 0x154   :  { %v719_v49 = vadd.f32 %v718_v60, %v632_v9 }
 0x155   :  { %v1811_v27 = vpop.f32.mrf.mxu1 }
 0x156   :  { %2030 = vtanh.f32 %v719_v49 }
 0x163   :  { %v2031_v43 = vpop.eup %2030 }
 0x164   :  { %v2724_v26 = vand.u32 4294901760, %v2031_v43 }
 0x166   :  { %1880 = vmatmul.mubr.f32.vlgmr.msra.gmra.mxu1 %v2724_v26  ;;  %v2728_v63 = vsub.f32 %v2031_v43, %v2724_v26 }
 0x167   :  { %1918 = vmatpush3.msra.mxu1 %v2529_v10  ;;  %1949 = vmatprep.mubr.msk.f32.mxu1 %vm2124_vm0, %v2123_v0 }
 0x168   :  { %1919 = vmatprep.subr.mxu1 %v2123_v0  ;;  %v822_v25 = vand.u32 4294901760, %v2728_v63 }
 0x169   :  { %1920 = vmatpush3.msra.mxu1 %v2531_v11 }
 0x16a   :  { %1921 = vmatprep.subr.mxu1 %v2123_v0  ;;  %v823_v49 = vsub.f32 %v2728_v63, %v822_v25 }
 0x16b   :  { %1922 = vmatpush3.msra.mxu1 %v2533_v12 }
 0x16c   :  { %1923 = vmatprep.subr.mxu1 %v2123_v0  ;;  %v824_v60 = vand.u32 4294901760, %v823_v49 }
 0x16d   :  { %1924 = vmatpush3.msra.mxu1 %v2564_v30 }
 0x16e   :  { %1925 = vmatprep.subr.mxu1 %v2123_v0  ;;  %1845 = vmatmul.mubr.f32.vlgmr.msra.gmra.mxu0 %v824_v60 }
 0x16f   :  { %1883 = vmatpush3.msra.mxu0 %v2536_v15  ;;  %1926 = vmatpush3.msra.mxu1 %v2570_v40  ;;  %v2900_v15 = vand.u32 4294901760, %v2691_v42 }
 0x170   :  { %1884 = vmatprep.subr.mxu0 %v2123_v0  ;;  %1927 = vmatprep.subr.mxu1 %v2123_v0 }
 0x171   :  { %1885 = vmatpush3.msra.mxu0 %v2539_v16  ;;  %1928 = vmatpush3.msra.mxu1 %v2578_v47 }
 0x172   :  { %1886 = vmatprep.subr.mxu0 %v2123_v0  ;;  %1929 = vmatprep.subr.mxu1 %v2123_v0 }
 0x173   :  { %1887 = vmatpush3.msra.mxu0 %v2542_v17  ;;  %1930 = vmatpush3.msra.mxu1 %v2589_v59 }
 0x174   :  { %1888 = vmatprep.subr.mxu0 %v2123_v0  ;;  %1931 = vmatprep.subr.mxu1 %v2123_v0 }
 0x175   :  { %1889 = vmatpush3.msra.mxu0 %v2568_v35  ;;  %1932 = vmatpush3.msra.mxu1 %v2601_v13 }
 0x176   :  { %1890 = vmatprep.subr.mxu0 %v2123_v0  ;;  %1933 = vmatprep.subr.mxu1 %v2123_v0 }
 0x177   :  { %1891 = vmatpush3.msra.mxu0 %v2576_v46  ;;  %1934 = vmatpush3.msra.mxu1 %v2608_v37 }
 0x178   :  { %1892 = vmatprep.subr.mxu0 %v2123_v0  ;;  %1935 = vmatprep.subr.mxu1 %v2123_v0 }
 0x179   :  { %1893 = vmatpush3.msra.mxu0 %v2587_v57  ;;  %1936 = vmatpush3.msra.mxu1 %v2621_v54 }
 0x17a   :  { %1894 = vmatprep.subr.mxu0 %v2123_v0  ;;  %1937 = vmatprep.subr.mxu1 %v2123_v0 }
 0x17b   :  { %1895 = vmatpush3.msra.mxu0 %v2598_v8  ;;  %1938 = vmatpush3.msra.mxu1 %v2631_v7 }
 0x17c   :  { %1896 = vmatprep.subr.mxu0 %v2123_v0  ;;  %1939 = vmatprep.subr.mxu1 %v2123_v0 }
 0x17d   :  { %1897 = vmatpush3.msra.mxu0 %v2612_v38  ;;  %1940 = vmatpush3.msra.mxu1 %v2646_v41 }
 0x17e   :  { %1898 = vmatprep.subr.mxu0 %v2123_v0  ;;  %1941 = vmatprep.subr.mxu1 %v2123_v0 }
 0x17f   :  { %1899 = vmatpush3.msra.mxu0 %v2619_v52  ;;  %1942 = vmatpush3.msra.mxu1 %v2659_v23 }
 0x180   :  { %1900 = vmatprep.subr.mxu0 %v2123_v0  ;;  %1943 = vmatprep.subr.mxu1 %v2123_v0 }
 0x181   :  { %1901 = vmatpush3.msra.mxu0 %v2629_v2  ;;  %1944 = vmatpush3.msra.mxu1 %v2667_v29 }
 0x182   :  { %1902 = vmatprep.subr.mxu0 %v2123_v0  ;;  %1945 = vmatprep.subr.mxu1 %v2123_v0 }
 0x183   :  { %1903 = vmatpush3.msra.mxu0 %v2644_v39  ;;  %1946 = vmatpush3.msra.mxu1 %v2673_v53 }
 0x184   :  { %1904 = vmatprep.subr.mxu0 %v2123_v0  ;;  %1947 = vmatprep.subr.mxu1 %v2123_v0 }
 0x185   :  { %1905 = vmatpush3.msra.mxu0 %v2656_v22  ;;  %1948 = vmatpush3.msra.mxu1 %v2675_v61 }
 0x186   :  { %1906 = vmatprep.subr.mxu0 %v2123_v0  ;;  %1950 = vmatmul.mubr.f32.vlgmr.msra.gmra.mxu1 %v822_v25 }
 0x187   :  { %1987 = vmatprep.subr.mxu1 %v2123_v0  ;;  %1907 = vmatpush3.msra.mxu0 %v2671_v48 }
 0x188   :  { %1988 = vmatpush3.msra.mxu1 %v2529_v10  ;;  %1908 = vmatprep.subr.mxu0 %v2123_v0  ;;  %v2897_v10 = vand.u32 4294901760, %v2671_v48 }
 0x189   :  { %1989 = vmatprep.subr.mxu1 %v2123_v0  ;;  %1909 = vmatpush3.msra.mxu0 %v2683_v19 }
 0x18a   :  { %1990 = vmatpush3.msra.mxu1 %v2531_v11  ;;  %1910 = vmatprep.subr.mxu0 %v2123_v0  ;;  %v2898_v11 = vand.u32 4294901760, %v2683_v19 }
 0x18b   :  { %1991 = vmatprep.subr.mxu1 %v2123_v0  ;;  %1911 = vmatpush3.msra.mxu0 %v2688_v31 }
 0x18c   :  { %1992 = vmatpush3.msra.mxu1 %v2533_v12  ;;  %1912 = vmatprep.subr.mxu0 %v2123_v0  ;;  %v2899_v12 = vand.u32 4294901760, %v2688_v31 }
 0x18d   :  { %1993 = vmatprep.subr.mxu1 %v2123_v0  ;;  %1913 = vmatpush3.msra.mxu0 %v2691_v42 }
 0x18e   :  { %1914 = vmatprep.mubr.msk.f32.mxu0 %vm2124_vm0, %v2123_v0  ;;  %1994 = vmatpush3.msra.mxu1 %v2564_v30 }
 0x18f   :  { %1915 = vmatmul.mubr.f32.vlgmr.msra.gmra.mxu0 %v2728_v63  ;;  %1952 = vmatprep.subr.mxu0 %v2123_v0 }
 0x190   :  { %1995 = vmatprep.subr.mxu1 %v2123_v0  ;;  %1953 = vmatpush3.msra.mxu0 %v833_v18 }
 0x191   :  { %1996 = vmatpush3.msra.mxu1 %v2570_v40  ;;  %1954 = vmatprep.subr.mxu0 %v2123_v0 }
 0x192   :  { %1997 = vmatprep.subr.mxu1 %v2123_v0  ;;  %1955 = vmatpush3.msra.mxu0 %v840_v20 }
 0x193   :  { %1998 = vmatpush3.msra.mxu1 %v2578_v47  ;;  %1956 = vmatprep.subr.mxu0 %v2123_v0 }
 0x194   :  { %1999 = vmatprep.subr.mxu1 %v2123_v0  ;;  %1957 = vmatpush3.msra.mxu0 %v847_v21 }
 0x195   :  { %2000 = vmatpush3.msra.mxu1 %v2589_v59  ;;  %1958 = vmatprep.subr.mxu0 %v2123_v0 }
 0x196   :  { %2001 = vmatprep.subr.mxu1 %v2123_v0  ;;  %1959 = vmatpush3.msra.mxu0 %v854_v45 }
 0x197   :  { %2002 = vmatpush3.msra.mxu1 %v2601_v13  ;;  %1960 = vmatprep.subr.mxu0 %v2123_v0 }
 0x198   :  { %2003 = vmatprep.subr.mxu1 %v2123_v0  ;;  %1961 = vmatpush3.msra.mxu0 %v861_v55 }
 0x199   :  { %2004 = vmatpush3.msra.mxu1 %v2608_v37  ;;  %1962 = vmatprep.subr.mxu0 %v2123_v0 }
 0x19a   :  { %2005 = vmatprep.subr.mxu1 %v2123_v0  ;;  %1963 = vmatpush3.msra.mxu0 %v868_v3 }
 0x19b   :  { %2006 = vmatpush3.msra.mxu1 %v2621_v54  ;;  %1964 = vmatprep.subr.mxu0 %v2123_v0 }
 0x19c   :  { %2007 = vmatprep.subr.mxu1 %v2123_v0  ;;  %1965 = vmatpush3.msra.mxu0 %v875_v32 }
 0x19d   :  { %2008 = vmatpush3.msra.mxu1 %v2631_v7  ;;  %1966 = vmatprep.subr.mxu0 %v2123_v0 }
 0x19e   :  { %2009 = vmatprep.subr.mxu1 %v2123_v0  ;;  %1967 = vmatpush3.msra.mxu0 %v882_v56 }
 0x19f   :  { %2010 = vmatpush3.msra.mxu1 %v2646_v41  ;;  %1968 = vmatprep.subr.mxu0 %v2123_v0 }
 0x1a0   :  { %2011 = vmatprep.subr.mxu1 %v2123_v0  ;;  %1969 = vmatpush3.msra.mxu0 %v889_v1 }
 0x1a1   :  { %2012 = vmatpush3.msra.mxu1 %v2659_v23  ;;  %1970 = vmatprep.subr.mxu0 %v2123_v0 }
 0x1a2   :  { %2013 = vmatprep.subr.mxu1 %v2123_v0  ;;  %1971 = vmatpush3.msra.mxu0 %v896_v36 }
 0x1a3   :  { %2014 = vmatpush3.msra.mxu1 %v2667_v29  ;;  %1972 = vmatprep.subr.mxu0 %v2123_v0 }
 0x1a4   :  { %2015 = vmatprep.subr.mxu1 %v2123_v0  ;;  %1973 = vmatpush3.msra.mxu0 %v903_v6 }
 0x1a5   :  { %2016 = vmatpush3.msra.mxu1 %v2673_v53  ;;  %1974 = vmatprep.subr.mxu0 %v2123_v0 }
 0x1a6   :  { %2017 = vmatprep.subr.mxu1 %v2123_v0  ;;  %1975 = vmatpush3.msra.mxu0 %v910_v28 }
 0x1a7   :  { %2018 = vmatpush3.msra.mxu1 %v2675_v61  ;;  %2019 = vmatprep.mubr.msk.f32.mxu1 %vm2124_vm0, %v2123_v0 }
 0x1a8   :  { %1976 = vmatprep.subr.mxu0 %v2123_v0  ;;  %2020 = vmatmul.mubr.f32.vlgmr.msra.gmra.mxu1 %v2724_v26 }
 0x1a9   :  { %1977 = vmatpush3.msra.mxu0 %v2897_v10  ;;  %1984 = vmatprep.mubr.msk.f32.mxu0 %vm2124_vm0, %v2123_v0 }
 0x1aa   :  { %1978 = vmatprep.subr.mxu0 %v2123_v0 }
 0x1ab   :  { %1979 = vmatpush3.msra.mxu0 %v2898_v11 }
 0x1ac   :  { %1980 = vmatprep.subr.mxu0 %v2123_v0 }
 0x1ad   :  { %1981 = vmatpush3.msra.mxu0 %v2899_v12 }
 0x1ae   :  { %1982 = vmatprep.subr.mxu0 %v2123_v0 }
 0x1af   :  { %1983 = vmatpush3.msra.mxu0 %v2900_v15 }
 0x1b0   :  { %1985 = vmatmul.mubr.f32.vlgmr.msra.gmra.mxu0 %v2724_v26 }
 0x226   :  { %v977_v16 = vpop.f32.mrf.mxu1 }
 0x228   :  { %v1881_v17 = vpop.f32.mrf.mxu1 }
 0x22e   :  { %v826_v18 = vpop.f32.mrf.mxu0 }
 0x22f   :  { %v978_v46 = vadd.f32 %v977_v16, %v826_v18 }
 0x230   :  { %v1846_v20 = vpop.f32.mrf.mxu0 }
 0x246   :  { %v1170_v21 = vpop.f32.mrf.mxu1 }
 0x248   :  { %v1951_v30 = vpop.f32.mrf.mxu1 }
 0x24f   :  { %v1081_v35 = vpop.f32.mrf.mxu0 }
 0x250   :  { %v1082_v55 = vadd.f32 %v1081_v35, %v978_v46 }
 0x251   :  { %v1916_v40 = vpop.f32.mrf.mxu0 }
 0x252   :  { %v1171_v57 = vadd.f32 %v1170_v21, %v1082_v55 }
 0x268   :  { %v1376_v45 = vpop.f32.mrf.mxu1 }
 0x26a   :  { %v2021_v47 = vpop.f32.mrf.mxu1 }
 0x270   :  { %v1289_v59 = vpop.f32.mrf.mxu0 }
 0x271   :  { %v1290_v0 = vadd.f32 %v1289_v59, %v1171_v57 }
 0x272   :  { %v1986_v3 = vpop.f32.mrf.mxu0 }
 0x273   :  { %v1377_v8 = vadd.f32 %v1376_v45, %v1290_v0 }
 0x275   :  { %1380 = vst [vmem:[#allocation8] sm:$0xff] %v1377_v8 }
 0x276   :  { %2103 = shalt.err (!%p2100_p5)
}
 0x277   :  { %1390 = dma.vmem_to_hbm [thread:$0]  %s1388_s5, 128, %s2892_s4, [#allocation4]  }
 0x278   :  { %2116 = dma.done.wait [#allocation4], 128  }
 0x279   :  { %2117 = vsyncadd [#allocation4], 4294967168 }
 0x27a   :  { %1394 = vsyncpa [#allocation3], 1 }
 0x27b   :  { %1395 = vsyncpa [#allocation6], 1 }
 0x27c   :  { %1396 = vsyncpa [#allocation4], 1 }

// kernel: tpu_custom_call.1
= control target key start
LH: loop header
LB: loop body
LE: loop exit
PB: predicated region body
PF: predicated region fallthrough
CT: control target
= control target key end

     0   :  { %9 = vsyncpa [#allocation3], 0  ;;  %s2888_s0 = inlined_call_operand.hbm [shape: f32[8,128], index: 0, kind: input, shape index: {}]   ;;  %s2889_s1 = inlined_call_operand.hbm [shape: f32[128,128], index: 1, kind: input, shape index: {}]   ;;  %s2890_s2 = inlined_call_operand.vmem [shape: f32[1,128], index: 2, kind: input, shape index: {}]   ;;  %s2891_s3 = inlined_call_operand.hbm [shape: f32[128,128], index: 3, kind: input, shape index: {}]   ;;  %s2892_s4 = inlined_call_operand.hbm [shape: f32[8,128], index: 4, kind: output, shape index: {}]  }
   0x1   :  { %10 = vsyncpa [#allocation6], 0 }
   0x2   :  { %11 = vsyncpa [#allocation4], 0  ;;  %s2118_s15 = smov [#allocation5]  }
   0x3   :  { %s27_s16 = sshll.u32 %s2118_s15, 4  ;;  %s28_s16 = int_to_ptr.vmem [resolvable:$true] %s27_s16 }
   0x4   :  { %s2040_s17 = scalar_lea.vmem %s28_s16, 2048  ;;  %p2045_p1 = scmp.lt.s32.totalorder %s28_s16, %s28_s16 }
   0x5   :  { %p2041_p0 = scmp.ne.s32.totalorder %s28_s16, %s2040_s17  ;;  %p2046_p2 = scmp.lt.s32.totalorder %s2040_s17, %s2040_s17 }
   0x7   :  { %p2047_p3 = por %p2046_p2, %p2045_p1 }
   0x9   :  { %p2048_p4 = pnand %p2047_p3, %p2041_p0 }
   0xb   :  { %2051 = shalt.err (!%p2048_p4)
}
   0xc   :  { %s2119_s18 = smov 128   ;;  %s2120_s19 = smov 8  }
   0xd   :  { %33 = dma.hbm_to_vmem [thread:$0]  %s2889_s1, 2048, %s28_s16, [#allocation6], %s2119_s18, %s2119_s18, %s2120_s19  }
   0xe   :  { %s2121_s22 = smov [#allocation2]   ;;  %s2122_s24 = smov [#allocation7]  }
   0xf   :  { %s18_s23 = sshll.u32 %s2121_s22, 4  ;;  %s41_s25 = sshll.u32 %s2122_s24, 4  ;;  %s19_s23 = int_to_ptr.vmem [resolvable:$true] %s18_s23  ;;  %s42_s25 = int_to_ptr.vmem [resolvable:$true] %s41_s25 }
  0x10   :  { %s2060_s26 = scalar_lea.vmem %s19_s23, 128  ;;  %p2065_p6 = scmp.lt.s32.totalorder %s19_s23, %s19_s23 }
  0x11   :  { %p2061_p5 = scmp.ne.s32.totalorder %s19_s23, %s2060_s26  ;;  %p2066_p7 = scmp.lt.s32.totalorder %s2060_s26, %s2060_s26 }
  0x13   :  { %p2067_p8 = por %p2066_p7, %p2065_p6 }
  0x15   :  { %p2068_p9 = pnand %p2067_p8, %p2061_p5 }
  0x17   :  { %2071 = shalt.err (!%p2068_p9)
}
  0x18   :  { %21 = dma.hbm_to_vmem [thread:$0]  %s2888_s0, 128, %s19_s23, [#allocation3]  }
  0x19   :  { %s2080_s29 = scalar_lea.vmem %s42_s25, 2048  ;;  %p2085_p11 = scmp.lt.s32.totalorder %s42_s25, %s42_s25 }
  0x1a   :  { %p2081_p10 = scmp.ne.s32.totalorder %s42_s25, %s2080_s29  ;;  %p2086_p12 = scmp.lt.s32.totalorder %s2080_s29, %s2080_s29 }
  0x1c   :  { %p2087_p13 = por %p2086_p12, %p2085_p11 }
  0x1e   :  { %p2088_p0 = pnand %p2087_p13, %p2081_p10 }
  0x20   :  { %2091 = shalt.err (!%p2088_p0)
}
  0x21   :  { %47 = dma.hbm_to_vmem [thread:$0]  %s2891_s3, 2048, %s42_s25, [#allocation6], %s2119_s18, %s2119_s18, %s2120_s19  }
  0x22   :  { %2112 = dma.done.wait [#allocation3], 128  }
  0x23   :  { %2113 = vsyncadd [#allocation3], 4294967168 }
  0x24   :  { %2114 = dma.done.wait [#allocation6], 4096  }
  0x25   :  { %2115 = vsyncadd [#allocation6], 4294963200  ;;  %v2123_v0 = vmov 0.0   ;;  %vm2124_vm0 = vmmov 0   ;;  %v73_v1 = vld [vmem:[#allocation5 + $0x78] sm:$0xff]  ;;  %v72_v2 = vld [vmem:[#allocation5 + $0x70] sm:$0xff] }
  0x26   :  { %1602 = vmatprep.subr.mxu0 %v2123_v0  ;;  %1637 = vmatprep.subr.mxu1 %v2123_v0  ;;  %v71_v3 = vld [vmem:[#allocation5 + $0x68] sm:$0xff]  ;;  %v2166_v4 = vand.u32 4294901760, %v73_v1  ;;  %v2168_v5 = vand.u32 4294901760, %v72_v2  ;;  %v70_v7 = vld [vmem:[#allocation5 + $0x60] sm:$0xff]  ;;  %v69_v8 = vld [vmem:[#allocation5 + $0x58] sm:$0xff] }
  0x27   :  { %1634 = vmatprep.mubr.msk.f32.mxu0 %vm2124_vm0, %v2123_v0  ;;  %1669 = vmatprep.mubr.msk.f32.mxu1 %vm2124_vm0, %v2123_v0  ;;  %v2170_v6 = vand.u32 4294901760, %v71_v3  ;;  %v68_v9 = vld [vmem:[#allocation5 + $0x50] sm:$0xff]  ;;  %v2172_v10 = vand.u32 4294901760, %v70_v7  ;;  %v2174_v11 = vand.u32 4294901760, %v69_v8  ;;  %v67_v13 = vld [vmem:[#allocation5 + $0x48] sm:$0xff]  ;;  %v66_v14 = vld [vmem:[#allocation5 + $0x40] sm:$0xff] }
  0x28   :  { %v2176_v12 = vand.u32 4294901760, %v68_v9  ;;  %1603 = vmatpush3.msra.mxu0 %v2166_v4  ;;  %v2180_v15 = vsub.f32 %v73_v1, %v2166_v4  ;;  %v2183_v16 = vsub.f32 %v72_v2, %v2168_v5  ;;  %v2185_v17 = vand.u32 4294901760, %v67_v13  ;;  %v65_v19 = vld [vmem:[#allocation5 + $0x38] sm:$0xff]  ;;  %v64_v26 = vld [vmem:[#allocation5 + $0x30] sm:$0xff]  ;;  %v63_v36 = vld [vmem:[#allocation5 + $0x28] sm:$0xff] }
  0x29   :  { %v2188_v18 = vsub.f32 %v71_v3, %v2170_v6  ;;  %1604 = vmatprep.subr.mxu0 %v2123_v0  ;;  %v2192_v20 = vsub.f32 %v70_v7, %v2172_v10  ;;  %v2195_v21 = vsub.f32 %v69_v8, %v2174_v11  ;;  %v2201_v25 = vand.u32 4294901760, %v66_v14  ;;  %v62_v41 = vld [vmem:[#allocation5 + $0x20] sm:$0xff]  ;;  %v61_v49 = vld [vmem:[#allocation5 + $0x18] sm:$0xff]  ;;  %v60_v54 = vld [vmem:[#allocation5 + $0x10] sm:$0xff] }
  0x2a   :  { %1605 = vmatpush3.msra.mxu0 %v2168_v5  ;;  %v175_v22 = vand.u32 4294901760, %v2180_v15  ;;  %v182_v23 = vand.u32 4294901760, %v2183_v16  ;;  %v2205_v28 = vand.u32 4294901760, %v65_v19  ;;  %v2209_v30 = vsub.f32 %v68_v9, %v2176_v12  ;;  %v57_v50 = vld [vmem:[#allocation2] sm:$0xff]  ;;  %v59_v60 = vld [vmem:[#allocation5 + $0x8] sm:$0xff]  ;;  %v58_v7 = vld [vmem:[#allocation5] sm:$0xff] }
  0x2b   :  { %v189_v24 = vand.u32 4294901760, %v2188_v18  ;;  %1606 = vmatprep.subr.mxu0 %v2123_v0  ;;  %v196_v27 = vand.u32 4294901760, %v2192_v20  ;;  %v203_v29 = vand.u32 4294901760, %v2195_v21  ;;  %v2222_v34 = vsub.f32 %v67_v13, %v2185_v17 }
  0x2c   :  { %1607 = vmatpush3.msra.mxu0 %v2170_v6  ;;  %v176_v31 = vsub.f32 %v2180_v15, %v175_v22  ;;  %v183_v32 = vsub.f32 %v2183_v16, %v182_v23  ;;  %v2225_v35 = vand.u32 4294901760, %v64_v26  ;;  %v210_v40 = vand.u32 4294901760, %v2209_v30 }
  0x2d   :  { %v190_v33 = vsub.f32 %v2188_v18, %v189_v24  ;;  %1608 = vmatprep.subr.mxu0 %v2123_v0  ;;  %v197_v39 = vsub.f32 %v2192_v20, %v196_v27  ;;  %v204_v42 = vsub.f32 %v2195_v21, %v203_v29  ;;  %v2237_v43 = vsub.f32 %v66_v14, %v2201_v25 }
  0x2e   :  { %1609 = vmatpush3.msra.mxu0 %v2172_v10  ;;  %v177_v37 = vand.u32 4294901760, %v176_v31  ;;  %v184_v38 = vand.u32 4294901760, %v183_v32  ;;  %v2240_v45 = vand.u32 4294901760, %v63_v36  ;;  %v217_v46 = vand.u32 4294901760, %v2222_v34 }
  0x2f   :  { %1610 = vmatprep.subr.mxu0 %v2123_v0  ;;  %v191_v44 = vand.u32 4294901760, %v190_v33  ;;  %v2244_v47 = vsub.f32 %v65_v19, %v2205_v28  ;;  %v2248_v48 = vand.u32 4294901760, %v62_v41  ;;  %v198_v51 = vand.u32 4294901760, %v197_v39 }
  0x30   :  { %1611 = vmatpush3.msra.mxu0 %v2174_v11  ;;  %1638 = vmatpush3.msra.mxu1 %v177_v37  ;;  %v211_v52 = vsub.f32 %v2209_v30, %v210_v40  ;;  %v224_v53 = vand.u32 4294901760, %v2237_v43  ;;  %v2256_v55 = vsub.f32 %v64_v26, %v2225_v35  ;;  %v205_v56 = vand.u32 4294901760, %v204_v42 }
  0x31   :  { %1612 = vmatprep.subr.mxu0 %v2123_v0  ;;  %1639 = vmatprep.subr.mxu1 %v2123_v0  ;;  %v231_v57 = vand.u32 4294901760, %v2244_v47  ;;  %v218_v58 = vsub.f32 %v2222_v34, %v217_v46  ;;  %v2265_v59 = vand.u32 4294901760, %v61_v49  ;;  %v2268_v61 = vsub.f32 %v63_v36, %v2240_v45 }
  0x32   :  { %1613 = vmatpush3.msra.mxu0 %v2176_v12  ;;  %1640 = vmatpush3.msra.mxu1 %v184_v38  ;;  %v2270_v62 = vand.u32 4294901760, %v57_v50  ;;  %v2274_v63 = vand.u32 4294901760, %v60_v54  ;;  %v212_v1 = vand.u32 4294901760, %v211_v52  ;;  %v225_v2 = vsub.f32 %v2237_v43, %v224_v53 }
  0x33   :  { %1614 = vmatprep.subr.mxu0 %v2123_v0  ;;  %1641 = vmatprep.subr.mxu1 %v2123_v0  ;;  %v238_v3 = vand.u32 4294901760, %v2256_v55  ;;  %v2282_v8 = vsub.f32 %v62_v41, %v2248_v48  ;;  %v232_v9 = vsub.f32 %v2244_v47, %v231_v57  ;;  %v2289_v13 = vand.u32 4294901760, %v59_v60 }
  0x34   :  { %1615 = vmatpush3.msra.mxu0 %v2185_v17  ;;  %1642 = vmatpush3.msra.mxu1 %v191_v44  ;;  %v219_v14 = vand.u32 4294901760, %v218_v58  ;;  %v245_v19 = vand.u32 4294901760, %v2268_v61  ;;  %v2294_v26 = vsub.f32 %v57_v50, %v2270_v62  ;;  %v2297_v31 = vsub.f32 %v61_v49, %v2265_v59 }
  0x35   :  { %1616 = vmatprep.subr.mxu0 %v2123_v0  ;;  %1643 = vmatprep.subr.mxu1 %v2123_v0  ;;  %v2301_v32 = vand.u32 4294901760, %v58_v7  ;;  %v226_v33 = vand.u32 4294901760, %v225_v2  ;;  %v239_v36 = vsub.f32 %v2256_v55, %v238_v3  ;;  %v252_v37 = vand.u32 4294901760, %v2282_v8 }
  0x36   :  { %1617 = vmatpush3.msra.mxu0 %v2201_v25  ;;  %1644 = vmatpush3.msra.mxu1 %v198_v51  ;;  %v2309_v38 = vsub.f32 %v60_v54, %v2274_v63  ;;  %v233_v39 = vand.u32 4294901760, %v232_v9  ;;  %v246_v41 = vsub.f32 %v2268_v61, %v245_v19  ;;  %v164_v42 = vand.u32 4294901760, %v2294_v26 }
  0x37   :  { %1618 = vmatprep.subr.mxu0 %v2123_v0  ;;  %1645 = vmatprep.subr.mxu1 %v2123_v0  ;;  %v259_v44 = vand.u32 4294901760, %v2297_v31  ;;  %v2320_v49 = vsub.f32 %v59_v60, %v2289_v13  ;;  %v240_v50 = vand.u32 4294901760, %v239_v36  ;;  %v253_v51 = vsub.f32 %v2282_v8, %v252_v37 }
  0x38   :  { %1619 = vmatpush3.msra.mxu0 %v2205_v28  ;;  %1646 = vmatpush3.msra.mxu1 %v205_v56  ;;  %v266_v52 = vand.u32 4294901760, %v2309_v38  ;;  %v2330_v54 = vsub.f32 %v58_v7, %v2301_v32  ;;  %v247_v56 = vand.u32 4294901760, %v246_v41  ;;  %v165_v58 = vsub.f32 %v2294_v26, %v164_v42 }
  0x39   :  { %1620 = vmatprep.subr.mxu0 %v2123_v0  ;;  %1647 = vmatprep.subr.mxu1 %v2123_v0  ;;  %v260_v60 = vsub.f32 %v2297_v31, %v259_v44  ;;  %v254_v2 = vand.u32 4294901760, %v253_v51 }
  0x3a   :  { %1621 = vmatpush3.msra.mxu0 %v2225_v35  ;;  %1648 = vmatpush3.msra.mxu1 %v212_v1  ;;  %v273_v1 = vand.u32 4294901760, %v2320_v49  ;;  %v267_v7 = vsub.f32 %v2309_v38, %v266_v52  ;;  %v280_v9 = vand.u32 4294901760, %v2330_v54 }
  0x3b   :  { %1622 = vmatprep.subr.mxu0 %v2123_v0  ;;  %1649 = vmatprep.subr.mxu1 %v2123_v0 }
  0x3c   :  { %1623 = vmatpush3.msra.mxu0 %v2240_v45  ;;  %1650 = vmatpush3.msra.mxu1 %v219_v14  ;;  %v166_v14 = vand.u32 4294901760, %v165_v58  ;;  %v274_v36 = vsub.f32 %v2320_v49, %v273_v1  ;;  %v281_v41 = vsub.f32 %v2330_v54, %v280_v9  ;;  %v728_v58 = vld [vmem:[#allocation7 + $0x28] sm:$0xff] }
  0x3d   :  { %1624 = vmatprep.subr.mxu0 %v2123_v0  ;;  %1651 = vmatprep.subr.mxu1 %v2123_v0 }
  0x3e   :  { %1625 = vmatpush3.msra.mxu0 %v2248_v48  ;;  %1652 = vmatpush3.msra.mxu1 %v226_v33  ;;  %v261_v33 = vand.u32 4294901760, %v260_v60  ;;  %v282_v51 = vand.u32 4294901760, %v281_v41 }
  0x3f   :  { %1626 = vmatprep.subr.mxu0 %v2123_v0  ;;  %1653 = vmatprep.subr.mxu1 %v2123_v0 }
  0x40   :  { %1627 = vmatpush3.msra.mxu0 %v2265_v59  ;;  %1654 = vmatpush3.msra.mxu1 %v233_v39  ;;  %v268_v39 = vand.u32 4294901760, %v267_v7  ;;  %v2631_v7 = vand.u32 4294901760, %v728_v58 }
  0x41   :  { %1628 = vmatprep.subr.mxu0 %v2123_v0  ;;  %1655 = vmatprep.subr.mxu1 %v2123_v0 }
  0x42   :  { %1629 = vmatpush3.msra.mxu0 %v2274_v63  ;;  %1656 = vmatpush3.msra.mxu1 %v240_v50  ;;  %v275_v50 = vand.u32 4294901760, %v274_v36 }
  0x43   :  { %1630 = vmatprep.subr.mxu0 %v2123_v0  ;;  %1657 = vmatprep.subr.mxu1 %v2123_v0 }
  0x44   :  { %1631 = vmatpush3.msra.mxu0 %v2289_v13  ;;  %1658 = vmatpush3.msra.mxu1 %v247_v56 }
  0x45   :  { %1632 = vmatprep.subr.mxu0 %v2123_v0  ;;  %1659 = vmatprep.subr.mxu1 %v2123_v0 }
  0x46   :  { %1633 = vmatpush3.msra.mxu0 %v2301_v32  ;;  %1660 = vmatpush3.msra.mxu1 %v254_v2 }
  0x47   :  { %1661 = vmatprep.subr.mxu1 %v2123_v0  ;;  %1672 = vmatprep.subr.mxu0 %v2123_v0 }
  0x48   :  { %1635 = vmatmul.mubr.f32.vlgmr.msra.gmra.mxu0 %v166_v14  ;;  %1662 = vmatpush3.msra.mxu1 %v261_v33  ;;  %v727_v14 = vld [vmem:[#allocation7 + $0x20] sm:$0xff] }
  0x49   :  { %1673 = vmatpush3.msra.mxu0 %v2180_v15  ;;  %1663 = vmatprep.subr.mxu1 %v2123_v0  ;;  %v2646_v41 = vand.u32 4294901760, %v727_v14 }
  0x4a   :  { %1674 = vmatprep.subr.mxu0 %v2123_v0  ;;  %1664 = vmatpush3.msra.mxu1 %v268_v39  ;;  %v2644_v39 = vsub.f32 %v728_v58, %v2631_v7 }
  0x4b   :  { %1675 = vmatpush3.msra.mxu0 %v2183_v16  ;;  %1665 = vmatprep.subr.mxu1 %v2123_v0 }
  0x4c   :  { %1676 = vmatprep.subr.mxu0 %v2123_v0  ;;  %1666 = vmatpush3.msra.mxu1 %v275_v50 }
  0x4d   :  { %1677 = vmatpush3.msra.mxu0 %v2188_v18  ;;  %1667 = vmatprep.subr.mxu1 %v2123_v0 }
  0x4e   :  { %1678 = vmatprep.subr.mxu0 %v2123_v0  ;;  %1668 = vmatpush3.msra.mxu1 %v282_v51  ;;  %v726_v51 = vld [vmem:[#allocation7 + $0x18] sm:$0xff] }
  0x4f   :  { %1679 = vmatpush3.msra.mxu0 %v2192_v20  ;;  %1670 = vmatmul.mubr.f32.vlgmr.msra.gmra.mxu1 %v2270_v62 }
  0x50   :  { %1680 = vmatprep.subr.mxu0 %v2123_v0  ;;  %1707 = vmatprep.subr.mxu1 %v2123_v0 }
  0x51   :  { %1681 = vmatpush3.msra.mxu0 %v2195_v21  ;;  %1708 = vmatpush3.msra.mxu1 %v2166_v4 }
  0x52   :  { %1682 = vmatprep.subr.mxu0 %v2123_v0  ;;  %1709 = vmatprep.subr.mxu1 %v2123_v0 }
  0x53   :  { %1683 = vmatpush3.msra.mxu0 %v2209_v30  ;;  %1710 = vmatpush3.msra.mxu1 %v2168_v5 }
  0x54   :  { %1684 = vmatprep.subr.mxu0 %v2123_v0  ;;  %1711 = vmatprep.subr.mxu1 %v2123_v0 }
  0x55   :  { %1685 = vmatpush3.msra.mxu0 %v2222_v34  ;;  %1712 = vmatpush3.msra.mxu1 %v2170_v6  ;;  %v734_v34 = vld [vmem:[#allocation7 + $0x58] sm:$0xff] }
  0x56   :  { %1686 = vmatprep.subr.mxu0 %v2123_v0  ;;  %1713 = vmatprep.subr.mxu1 %v2123_v0 }
  0x57   :  { %1687 = vmatpush3.msra.mxu0 %v2237_v43  ;;  %1714 = vmatpush3.msra.mxu1 %v2172_v10  ;;  %v733_v43 = vld [vmem:[#allocation7 + $0x50] sm:$0xff] }
  0x58   :  { %1688 = vmatprep.subr.mxu0 %v2123_v0  ;;  %1715 = vmatprep.subr.mxu1 %v2123_v0 }
  0x59   :  { %1689 = vmatpush3.msra.mxu0 %v2244_v47  ;;  %1716 = vmatpush3.msra.mxu1 %v2174_v11  ;;  %v2578_v47 = vand.u32 4294901760, %v733_v43 }
  0x5a   :  { %1690 = vmatprep.subr.mxu0 %v2123_v0  ;;  %1717 = vmatprep.subr.mxu1 %v2123_v0 }
  0x5b   :  { %1691 = vmatpush3.msra.mxu0 %v2256_v55  ;;  %1718 = vmatpush3.msra.mxu1 %v2176_v12 }
  0x5c   :  { %1692 = vmatprep.subr.mxu0 %v2123_v0  ;;  %1719 = vmatprep.subr.mxu1 %v2123_v0 }
  0x5d   :  { %1693 = vmatpush3.msra.mxu0 %v2268_v61  ;;  %1720 = vmatpush3.msra.mxu1 %v2185_v17  ;;  %v731_v61 = vld [vmem:[#allocation7 + $0x40] sm:$0xff] }
  0x5e   :  { %1694 = vmatprep.subr.mxu0 %v2123_v0  ;;  %1721 = vmatprep.subr.mxu1 %v2123_v0 }
  0x5f   :  { %1695 = vmatpush3.msra.mxu0 %v2282_v8  ;;  %1722 = vmatpush3.msra.mxu1 %v2201_v25 }
  0x60   :  { %1696 = vmatprep.subr.mxu0 %v2123_v0  ;;  %1723 = vmatprep.subr.mxu1 %v2123_v0 }
  0x61   :  { %1697 = vmatpush3.msra.mxu0 %v2297_v31  ;;  %1724 = vmatpush3.msra.mxu1 %v2205_v28 }
  0x62   :  { %1698 = vmatprep.subr.mxu0 %v2123_v0  ;;  %1725 = vmatprep.subr.mxu1 %v2123_v0 }
  0x63   :  { %1699 = vmatpush3.msra.mxu0 %v2309_v38  ;;  %1726 = vmatpush3.msra.mxu1 %v2225_v35 }
  0x64   :  { %1700 = vmatprep.subr.mxu0 %v2123_v0  ;;  %1727 = vmatprep.subr.mxu1 %v2123_v0 }
  0x65   :  { %1701 = vmatpush3.msra.mxu0 %v2320_v49  ;;  %1728 = vmatpush3.msra.mxu1 %v2240_v45 }
  0x66   :  { %1702 = vmatprep.subr.mxu0 %v2123_v0  ;;  %1729 = vmatprep.subr.mxu1 %v2123_v0 }
  0x67   :  { %1703 = vmatpush3.msra.mxu0 %v2330_v54  ;;  %1704 = vmatprep.mubr.msk.f32.mxu0 %vm2124_vm0, %v2123_v0 }
  0x68   :  { %1730 = vmatpush3.msra.mxu1 %v2248_v48  ;;  %1705 = vmatmul.mubr.f32.vlgmr.msra.gmra.mxu0 %v2294_v26 }
  0x69   :  { %1731 = vmatprep.subr.mxu1 %v2123_v0  ;;  %1742 = vmatprep.subr.mxu0 %v2123_v0 }
  0x6a   :  { %1732 = vmatpush3.msra.mxu1 %v2265_v59  ;;  %1743 = vmatpush3.msra.mxu0 %v175_v22 }
  0x6b   :  { %1733 = vmatprep.subr.mxu1 %v2123_v0  ;;  %1744 = vmatprep.subr.mxu0 %v2123_v0 }
  0x6c   :  { %1734 = vmatpush3.msra.mxu1 %v2274_v63  ;;  %1745 = vmatpush3.msra.mxu0 %v182_v23 }
  0x6d   :  { %1735 = vmatprep.subr.mxu1 %v2123_v0  ;;  %1746 = vmatprep.subr.mxu0 %v2123_v0 }
  0x6e   :  { %1736 = vmatpush3.msra.mxu1 %v2289_v13  ;;  %1747 = vmatpush3.msra.mxu0 %v189_v24 }
  0x6f   :  { %1737 = vmatprep.subr.mxu1 %v2123_v0  ;;  %1748 = vmatprep.subr.mxu0 %v2123_v0 }
  0x70   :  { %1738 = vmatpush3.msra.mxu1 %v2301_v32  ;;  %1739 = vmatprep.mubr.msk.f32.mxu1 %vm2124_vm0, %v2123_v0 }
  0x71   :  { %1749 = vmatpush3.msra.mxu0 %v196_v27  ;;  %1740 = vmatmul.mubr.f32.vlgmr.msra.gmra.mxu1 %v164_v42  ;;  %v729_v42 = vld [vmem:[#allocation7 + $0x30] sm:$0xff] }
  0x72   :  { %1750 = vmatprep.subr.mxu0 %v2123_v0  ;;  %1777 = vmatprep.subr.mxu1 %v2123_v0  ;;  %v2621_v54 = vand.u32 4294901760, %v729_v42 }
  0x73   :  { %1751 = vmatpush3.msra.mxu0 %v203_v29  ;;  %1778 = vmatpush3.msra.mxu1 %v2166_v4  ;;  %v738_v4 = vld [vmem:[#allocation7 + $0x78] sm:$0xff]  ;;  %v735_v29 = vld [vmem:[#allocation7 + $0x60] sm:$0xff] }
  0x74   :  { %1752 = vmatprep.subr.mxu0 %v2123_v0  ;;  %1779 = vmatprep.subr.mxu1 %v2123_v0  ;;  %v2564_v30 = vand.u32 4294901760, %v735_v29  ;;  %v2629_v2 = vsub.f32 %v729_v42, %v2621_v54 }
  0x75   :  { %1753 = vmatpush3.msra.mxu0 %v210_v40  ;;  %1780 = vmatpush3.msra.mxu1 %v2168_v5  ;;  %v737_v5 = vld [vmem:[#allocation7 + $0x70] sm:$0xff]  ;;  %v2570_v40 = vand.u32 4294901760, %v734_v34 }
  0x76   :  { %1754 = vmatprep.subr.mxu0 %v2123_v0  ;;  %1781 = vmatprep.subr.mxu1 %v2123_v0  ;;  %v896_v36 = vand.u32 4294901760, %v2629_v2 }
  0x77   :  { %1755 = vmatpush3.msra.mxu0 %v217_v46  ;;  %1782 = vmatpush3.msra.mxu1 %v2170_v6  ;;  %v736_v6 = vld [vmem:[#allocation7 + $0x68] sm:$0xff]  ;;  %v2576_v46 = vsub.f32 %v734_v34, %v2570_v40 }
  0x78   :  { %1756 = vmatprep.subr.mxu0 %v2123_v0  ;;  %1783 = vmatprep.subr.mxu1 %v2123_v0  ;;  %v724_v34 = vld [vmem:[#allocation7 + $0x8] sm:$0xff] }
  0x79   :  { %1757 = vmatpush3.msra.mxu0 %v224_v53  ;;  %1784 = vmatpush3.msra.mxu1 %v2172_v10  ;;  %v2529_v10 = vand.u32 4294901760, %v738_v4  ;;  %v861_v55 = vand.u32 4294901760, %v2576_v46 }
  0x7a   :  { %1758 = vmatprep.subr.mxu0 %v2123_v0  ;;  %1785 = vmatprep.subr.mxu1 %v2123_v0 }
  0x7b   :  { %1759 = vmatpush3.msra.mxu0 %v231_v57  ;;  %1786 = vmatpush3.msra.mxu1 %v2174_v11  ;;  %v2531_v11 = vand.u32 4294901760, %v737_v5  ;;  %v2536_v15 = vsub.f32 %v738_v4, %v2529_v10  ;;  %v2587_v57 = vsub.f32 %v733_v43, %v2578_v47  ;;  %v723_v43 = vld [vmem:[#allocation7] sm:$0xff] }
  0x7c   :  { %1760 = vmatprep.subr.mxu0 %v2123_v0  ;;  %1787 = vmatprep.subr.mxu1 %v2123_v0 }
  0x7d   :  { %1761 = vmatpush3.msra.mxu0 %v238_v3  ;;  %1788 = vmatpush3.msra.mxu1 %v2176_v12  ;;  %v2533_v12 = vand.u32 4294901760, %v736_v6  ;;  %v2539_v16 = vsub.f32 %v737_v5, %v2531_v11  ;;  %v833_v18 = vand.u32 4294901760, %v2536_v15  ;;  %v868_v3 = vand.u32 4294901760, %v2587_v57 }
  0x7e   :  { %1762 = vmatprep.subr.mxu0 %v2123_v0  ;;  %1789 = vmatprep.subr.mxu1 %v2123_v0  ;;  %v897_v5 = vsub.f32 %v2629_v2, %v896_v36 }
  0x7f   :  { %1763 = vmatpush3.msra.mxu0 %v245_v19  ;;  %1790 = vmatpush3.msra.mxu1 %v2185_v17  ;;  %v2542_v17 = vsub.f32 %v736_v6, %v2533_v12  ;;  %v840_v20 = vand.u32 4294901760, %v2539_v16  ;;  %v834_v22 = vsub.f32 %v2536_v15, %v833_v18  ;;  %v730_v19 = vld [vmem:[#allocation7 + $0x38] sm:$0xff]  ;;  %v869_v31 = vsub.f32 %v2587_v57, %v868_v3 }
  0x80   :  { %1764 = vmatprep.subr.mxu0 %v2123_v0  ;;  %1791 = vmatprep.subr.mxu1 %v2123_v0  ;;  %v903_v6 = vand.u32 4294901760, %v2644_v39 }
  0x81   :  { %1765 = vmatpush3.msra.mxu0 %v252_v37  ;;  %1792 = vmatpush3.msra.mxu1 %v2201_v25  ;;  %v847_v21 = vand.u32 4294901760, %v2542_v17  ;;  %v841_v23 = vsub.f32 %v2539_v16, %v840_v20  ;;  %v835_v25 = vand.u32 4294901760, %v834_v22  ;;  %v2608_v37 = vand.u32 4294901760, %v730_v19 }
  0x82   :  { %1766 = vmatprep.subr.mxu0 %v2123_v0  ;;  %1793 = vmatprep.subr.mxu1 %v2123_v0  ;;  %v2656_v22 = vsub.f32 %v727_v14, %v2646_v41 }
  0x83   :  { %1767 = vmatpush3.msra.mxu0 %v259_v44  ;;  %1794 = vmatpush3.msra.mxu1 %v2205_v28  ;;  %v848_v24 = vsub.f32 %v2542_v17, %v847_v21  ;;  %v842_v27 = vand.u32 4294901760, %v841_v23  ;;  %v870_v44 = vand.u32 4294901760, %v869_v31  ;;  %v2659_v23 = vand.u32 4294901760, %v726_v51 }
  0x84   :  { %1768 = vmatprep.subr.mxu0 %v2123_v0  ;;  %1795 = vmatprep.subr.mxu1 %v2123_v0 }
  0x85   :  { %1769 = vmatpush3.msra.mxu0 %v266_v52  ;;  %1796 = vmatpush3.msra.mxu1 %v2225_v35  ;;  %v849_v28 = vand.u32 4294901760, %v848_v24  ;;  %v2568_v35 = vsub.f32 %v735_v29, %v2564_v30  ;;  %v2619_v52 = vsub.f32 %v730_v19, %v2608_v37  ;;  %v725_v24 = vld [vmem:[#allocation7 + $0x10] sm:$0xff] }
  0x86   :  { %1770 = vmatprep.subr.mxu0 %v2123_v0  ;;  %1797 = vmatprep.subr.mxu1 %v2123_v0  ;;  %v2667_v29 = vand.u32 4294901760, %v725_v24 }
  0x87   :  { %1771 = vmatpush3.msra.mxu0 %v273_v1  ;;  %1798 = vmatpush3.msra.mxu1 %v2240_v45  ;;  %v854_v45 = vand.u32 4294901760, %v2568_v35  ;;  %v889_v1 = vand.u32 4294901760, %v2619_v52 }
  0x88   :  { %1772 = vmatprep.subr.mxu0 %v2123_v0  ;;  %1799 = vmatprep.subr.mxu1 %v2123_v0  ;;  %v2683_v19 = vsub.f32 %v725_v24, %v2667_v29 }
  0x89   :  { %1773 = vmatpush3.msra.mxu0 %v280_v9  ;;  %1774 = vmatprep.mubr.msk.f32.mxu0 %vm2124_vm0, %v2123_v0  ;;  %v855_v53 = vsub.f32 %v2568_v35, %v854_v45  ;;  %v890_v33 = vsub.f32 %v2619_v52, %v889_v1 }
  0x8a   :  { %1800 = vmatpush3.msra.mxu1 %v2248_v48  ;;  %1775 = vmatmul.mubr.f32.vlgmr.msra.gmra.mxu0 %v2270_v62  ;;  %v732_v48 = vld [vmem:[#allocation7 + $0x48] sm:$0xff] }
  0x8b   :  { %1801 = vmatprep.subr.mxu1 %v2123_v0  ;;  %1809 = vmatprep.mubr.msk.f32.mxu1 %vm2124_vm0, %v2123_v0  ;;  %v891_v4 = vand.u32 4294901760, %v890_v33 }
  0x8c   :  { %1802 = vmatpush3.msra.mxu1 %v2265_v59  ;;  %1812 = vmatprep.subr.mxu0 %v2123_v0  ;;  %v2589_v59 = vand.u32 4294901760, %v732_v48 }
  0x8d   :  { %1803 = vmatprep.subr.mxu1 %v2123_v0  ;;  %1844 = vmatprep.mubr.msk.f32.mxu0 %vm2124_vm0, %v2123_v0 }
  0x8e   :  { %1804 = vmatpush3.msra.mxu1 %v2274_v63  ;;  %1813 = vmatpush3.msra.mxu0 %v2529_v10  ;;  %v862_v63 = vsub.f32 %v2576_v46, %v861_v55  ;;  %v2598_v8 = vsub.f32 %v732_v48, %v2589_v59  ;;  %v2671_v48 = vsub.f32 %v726_v51, %v2659_v23 }
  0x8f   :  { %1805 = vmatprep.subr.mxu1 %v2123_v0  ;;  %1814 = vmatprep.subr.mxu0 %v2123_v0 }
  0x90   :  { %1806 = vmatpush3.msra.mxu1 %v2289_v13  ;;  %1815 = vmatpush3.msra.mxu0 %v2531_v11  ;;  %v2601_v13 = vand.u32 4294901760, %v731_v61  ;;  %v863_v26 = vand.u32 4294901760, %v862_v63 }
  0x91   :  { %1807 = vmatprep.subr.mxu1 %v2123_v0  ;;  %1816 = vmatprep.subr.mxu0 %v2123_v0 }
  0x92   :  { %1808 = vmatpush3.msra.mxu1 %v2301_v32  ;;  %1817 = vmatpush3.msra.mxu0 %v2533_v12  ;;  %v875_v32 = vand.u32 4294901760, %v2598_v8  ;;  %v2612_v38 = vsub.f32 %v731_v61, %v2601_v13  ;;  %v2675_v61 = vand.u32 4294901760, %v723_v43 }
  0x93   :  { %1810 = vmatmul.mubr.f32.vlgmr.msra.gmra.mxu1 %v2270_v62  ;;  %1847 = vmatprep.subr.mxu1 %v2123_v0  ;;  %v856_v62 = vand.u32 4294901760, %v855_v53  ;;  %v2673_v53 = vand.u32 4294901760, %v724_v34 }
  0x94   :  { %1879 = vmatprep.mubr.msk.f32.mxu1 %vm2124_vm0, %v2123_v0  ;;  %1818 = vmatprep.subr.mxu0 %v2123_v0  ;;  %v876_v49 = vsub.f32 %v2598_v8, %v875_v32  ;;  %v882_v56 = vand.u32 4294901760, %v2612_v38  ;;  %v2691_v42 = vsub.f32 %v723_v43, %v2675_v61 }
  0x95   :  { %1848 = vmatpush3.msra.mxu1 %v835_v25  ;;  %1819 = vmatpush3.msra.mxu0 %v2564_v30  ;;  %v898_v25 = vand.u32 4294901760, %v897_v5  ;;  %v2688_v31 = vsub.f32 %v724_v34, %v2673_v53 }
  0x96   :  { %1849 = vmatprep.subr.mxu1 %v2123_v0  ;;  %1820 = vmatprep.subr.mxu0 %v2123_v0  ;;  %v877_v60 = vand.u32 4294901760, %v876_v49  ;;  %v883_v9 = vsub.f32 %v2612_v38, %v882_v56  ;;  %v2895_v49 = vand.u32 4294901760, %v2683_v19 }
  0x97   :  { %1850 = vmatpush3.msra.mxu1 %v842_v27  ;;  %1821 = vmatpush3.msra.mxu0 %v2570_v40  ;;  %v904_v27 = vsub.f32 %v2644_v39, %v903_v6 }
  0x98   :  { %1851 = vmatprep.subr.mxu1 %v2123_v0  ;;  %1822 = vmatprep.subr.mxu0 %v2123_v0  ;;  %v884_v50 = vand.u32 4294901760, %v883_v9  ;;  %v2893_v9 = vand.u32 4294901760, %v2691_v42  ;;  %v925_v14 = vsub.f32 %v2683_v19, %v2895_v49 }
  0x99   :  { %1852 = vmatpush3.msra.mxu1 %v849_v28  ;;  %1823 = vmatpush3.msra.mxu0 %v2578_v47  ;;  %v910_v28 = vand.u32 4294901760, %v2656_v22 }
  0x9a   :  { %1853 = vmatprep.subr.mxu1 %v2123_v0  ;;  %1824 = vmatprep.subr.mxu0 %v2123_v0  ;;  %v939_v51 = vsub.f32 %v2691_v42, %v2893_v9 }
  0x9b   :  { %1825 = vmatpush3.msra.mxu0 %v2589_v59  ;;  %1854 = vmatpush3.msra.mxu1 %v856_v62  ;;  %v905_v62 = vand.u32 4294901760, %v904_v27  ;;  %v911_v63 = vsub.f32 %v2656_v22, %v910_v28 }
  0x9c   :  { %1826 = vmatprep.subr.mxu0 %v2123_v0  ;;  %1855 = vmatprep.subr.mxu1 %v2123_v0  ;;  %v940_v24 = vand.u32 4294901760, %v939_v51 }
  0x9d   :  { %1827 = vmatpush3.msra.mxu0 %v2601_v13  ;;  %1856 = vmatpush3.msra.mxu1 %v863_v26  ;;  %v2896_v26 = vand.u32 4294901760, %v2671_v48 }
  0x9e   :  { %1828 = vmatprep.subr.mxu0 %v2123_v0  ;;  %1857 = vmatprep.subr.mxu1 %v2123_v0 }
  0x9f   :  { %1829 = vmatpush3.msra.mxu0 %v2608_v37  ;;  %1858 = vmatpush3.msra.mxu1 %v870_v44  ;;  %v912_v44 = vand.u32 4294901760, %v911_v63  ;;  %v918_v58 = vsub.f32 %v2671_v48, %v2896_v26 }
  0xa0   :  { %1830 = vmatprep.subr.mxu0 %v2123_v0  ;;  %1859 = vmatprep.subr.mxu1 %v2123_v0 }
  0xa1   :  { %1831 = vmatpush3.msra.mxu0 %v2621_v54  ;;  %1860 = vmatpush3.msra.mxu1 %v877_v60  ;;  %v2894_v60 = vand.u32 4294901760, %v2688_v31  ;;  %v919_v33 = vand.u32 4294901760, %v918_v58 }
  0xa2   :  { %1832 = vmatprep.subr.mxu0 %v2123_v0  ;;  %1861 = vmatprep.subr.mxu1 %v2123_v0 }
  0xa3   :  { %1833 = vmatpush3.msra.mxu0 %v2631_v7  ;;  %1862 = vmatpush3.msra.mxu1 %v884_v50  ;;  %v932_v50 = vsub.f32 %v2688_v31, %v2894_v60 }
  0xa4   :  { %1834 = vmatprep.subr.mxu0 %v2123_v0  ;;  %1863 = vmatprep.subr.mxu1 %v2123_v0 }
  0xa5   :  { %1835 = vmatpush3.msra.mxu0 %v2646_v41  ;;  %1864 = vmatpush3.msra.mxu1 %v891_v4  ;;  %v926_v4 = vand.u32 4294901760, %v925_v14  ;;  %v933_v5 = vand.u32 4294901760, %v932_v50  ;;  %v1397_v14 = vld [vmem:[%s2890_s2] ss:$0 sm:$0xff]  ;;  %s2125_s2 = smov [#allocation8]  }
  0xa6   :  { %1836 = vmatprep.subr.mxu0 %v2123_v0  ;;  %1865 = vmatprep.subr.mxu1 %v2123_v0  ;;  %s1387_s5 = sshll.u32 %s2125_s2, 4  ;;  %s1388_s5 = int_to_ptr.vmem [resolvable:$true] %s1387_s5 }
  0xa7   :  { %1837 = vmatpush3.msra.mxu0 %v2659_v23  ;;  %1866 = vmatpush3.msra.mxu1 %v898_v25  ;;  %s2092_s6 = scalar_lea.vmem %s1388_s5, 128  ;;  %p2097_p2 = scmp.lt.s32.totalorder %s1388_s5, %s1388_s5 }
  0xa8   :  { %1838 = vmatprep.subr.mxu0 %v2123_v0  ;;  %1867 = vmatprep.subr.mxu1 %v2123_v0  ;;  %p2093_p1 = scmp.ne.s32.totalorder %s1388_s5, %s2092_s6  ;;  %p2098_p3 = scmp.lt.s32.totalorder %s2092_s6, %s2092_s6 }
  0xa9   :  { %1839 = vmatpush3.msra.mxu0 %v2667_v29  ;;  %1868 = vmatpush3.msra.mxu1 %v905_v62 }
  0xaa   :  { %1840 = vmatprep.subr.mxu0 %v2123_v0  ;;  %1869 = vmatprep.subr.mxu1 %v2123_v0  ;;  %p2099_p4 = por %p2098_p3, %p2097_p2 }
  0xab   :  { %1841 = vmatpush3.msra.mxu0 %v2673_v53  ;;  %1870 = vmatpush3.msra.mxu1 %v912_v44 }
  0xac   :  { %1842 = vmatprep.subr.mxu0 %v2123_v0  ;;  %1871 = vmatprep.subr.mxu1 %v2123_v0  ;;  %p2100_p5 = pnand %p2099_p4, %p2093_p1 }
  0xad   :  { %1843 = vmatpush3.msra.mxu0 %v2675_v61  ;;  %1872 = vmatpush3.msra.mxu1 %v919_v33 }
  0xae   :  { %1882 = vmatprep.subr.mxu0 %v2123_v0  ;;  %1873 = vmatprep.subr.mxu1 %v2123_v0 }
  0xaf   :  { %1874 = vmatpush3.msra.mxu1 %v926_v4 }
  0xb0   :  { %1875 = vmatprep.subr.mxu1 %v2123_v0 }
  0xb1   :  { %1876 = vmatpush3.msra.mxu1 %v933_v5 }
  0xb2   :  { %1877 = vmatprep.subr.mxu1 %v2123_v0 }
  0xb3   :  { %1878 = vmatpush3.msra.mxu1 %v940_v24 }
  0xb4   :  { %1917 = vmatprep.subr.mxu1 %v2123_v0 }
 0x108   :  { %v168_v25 = vpop.f32.mrf.mxu0 }
 0x109   :  { %v169_v33 = vadd.f32 %v1397_v14, %v168_v25 }
 0x10a   :  { %v1636_v27 = vpop.f32.mrf.mxu0 }
 0x10f   :  { %v319_v34 = vpop.f32.mrf.mxu1 }
 0x110   :  { %v320_v51 = vadd.f32 %v319_v34, %v169_v33 }
 0x111   :  { %v1671_v43 = vpop.f32.mrf.mxu1 }
 0x128   :  { %v423_v62 = vpop.f32.mrf.mxu0 }
 0x129   :  { %v424_v5 = vadd.f32 %v423_v62, %v320_v51 }
 0x12a   :  { %v1706_v63 = vpop.f32.mrf.mxu0 }
 0x131   :  { %v512_v44 = vpop.f32.mrf.mxu1 }
 0x132   :  { %v513_v24 = vadd.f32 %v512_v44, %v424_v5 }
 0x133   :  { %v1741_v58 = vpop.f32.mrf.mxu1 }
 0x14a   :  { %v631_v50 = vpop.f32.mrf.mxu0 }
 0x14b   :  { %v632_v9 = vadd.f32 %v631_v50, %v513_v24 }
 0x14c   :  { %v1776_v4 = vpop.f32.mrf.mxu0 }
 0x153   :  { %v718_v60 = vpop.f32.mrf.mxu1 }
 0x154   :  { %v719_v49 = vadd.f32 %v718_v60, %v632_v9 }
 0x155   :  { %v1811_v27 = vpop.f32.mrf.mxu1 }
 0x156   :  { %2030 = vtanh.f32 %v719_v49 }
 0x163   :  { %v2031_v43 = vpop.eup %2030 }
 0x164   :  { %v2724_v26 = vand.u32 4294901760, %v2031_v43 }
 0x166   :  { %1880 = vmatmul.mubr.f32.vlgmr.msra.gmra.mxu1 %v2724_v26  ;;  %v2728_v63 = vsub.f32 %v2031_v43, %v2724_v26 }
 0x167   :  { %1918 = vmatpush3.msra.mxu1 %v2529_v10  ;;  %1949 = vmatprep.mubr.msk.f32.mxu1 %vm2124_vm0, %v2123_v0 }
 0x168   :  { %1919 = vmatprep.subr.mxu1 %v2123_v0  ;;  %v822_v25 = vand.u32 4294901760, %v2728_v63 }
 0x169   :  { %1920 = vmatpush3.msra.mxu1 %v2531_v11 }
 0x16a   :  { %1921 = vmatprep.subr.mxu1 %v2123_v0  ;;  %v823_v49 = vsub.f32 %v2728_v63, %v822_v25 }
 0x16b   :  { %1922 = vmatpush3.msra.mxu1 %v2533_v12 }
 0x16c   :  { %1923 = vmatprep.subr.mxu1 %v2123_v0  ;;  %v824_v60 = vand.u32 4294901760, %v823_v49 }
 0x16d   :  { %1924 = vmatpush3.msra.mxu1 %v2564_v30 }
 0x16e   :  { %1925 = vmatprep.subr.mxu1 %v2123_v0  ;;  %1845 = vmatmul.mubr.f32.vlgmr.msra.gmra.mxu0 %v824_v60 }
 0x16f   :  { %1883 = vmatpush3.msra.mxu0 %v2536_v15  ;;  %1926 = vmatpush3.msra.mxu1 %v2570_v40  ;;  %v2900_v15 = vand.u32 4294901760, %v2691_v42 }
 0x170   :  { %1884 = vmatprep.subr.mxu0 %v2123_v0  ;;  %1927 = vmatprep.subr.mxu1 %v2123_v0 }
 0x171   :  { %1885 = vmatpush3.msra.mxu0 %v2539_v16  ;;  %1928 = vmatpush3.msra.mxu1 %v2578_v47 }
 0x172   :  { %1886 = vmatprep.subr.mxu0 %v2123_v0  ;;  %1929 = vmatprep.subr.mxu1 %v2123_v0 }
 0x173   :  { %1887 = vmatpush3.msra.mxu0 %v2542_v17  ;;  %1930 = vmatpush3.msra.mxu1 %v2589_v59 }
 0x174   :  { %1888 = vmatprep.subr.mxu0 %v2123_v0  ;;  %1931 = vmatprep.subr.mxu1 %v2123_v0 }
 0x175   :  { %1889 = vmatpush3.msra.mxu0 %v2568_v35  ;;  %1932 = vmatpush3.msra.mxu1 %v2601_v13 }
 0x176   :  { %1890 = vmatprep.subr.mxu0 %v2123_v0  ;;  %1933 = vmatprep.subr.mxu1 %v2123_v0 }
 0x177   :  { %1891 = vmatpush3.msra.mxu0 %v2576_v46  ;;  %1934 = vmatpush3.msra.mxu1 %v2608_v37 }
 0x178   :  { %1892 = vmatprep.subr.mxu0 %v2123_v0  ;;  %1935 = vmatprep.subr.mxu1 %v2123_v0 }
 0x179   :  { %1893 = vmatpush3.msra.mxu0 %v2587_v57  ;;  %1936 = vmatpush3.msra.mxu1 %v2621_v54 }
 0x17a   :  { %1894 = vmatprep.subr.mxu0 %v2123_v0  ;;  %1937 = vmatprep.subr.mxu1 %v2123_v0 }
 0x17b   :  { %1895 = vmatpush3.msra.mxu0 %v2598_v8  ;;  %1938 = vmatpush3.msra.mxu1 %v2631_v7 }
 0x17c   :  { %1896 = vmatprep.subr.mxu0 %v2123_v0  ;;  %1939 = vmatprep.subr.mxu1 %v2123_v0 }
 0x17d   :  { %1897 = vmatpush3.msra.mxu0 %v2612_v38  ;;  %1940 = vmatpush3.msra.mxu1 %v2646_v41 }
 0x17e   :  { %1898 = vmatprep.subr.mxu0 %v2123_v0  ;;  %1941 = vmatprep.subr.mxu1 %v2123_v0 }
 0x17f   :  { %1899 = vmatpush3.msra.mxu0 %v2619_v52  ;;  %1942 = vmatpush3.msra.mxu1 %v2659_v23 }
 0x180   :  { %1900 = vmatprep.subr.mxu0 %v2123_v0  ;;  %1943 = vmatprep.subr.mxu1 %v2123_v0 }
 0x181   :  { %1901 = vmatpush3.msra.mxu0 %v2629_v2  ;;  %1944 = vmatpush3.msra.mxu1 %v2667_v29 }
 0x182   :  { %1902 = vmatprep.subr.mxu0 %v2123_v0  ;;  %1945 = vmatprep.subr.mxu1 %v2123_v0 }
 0x183   :  { %1903 = vmatpush3.msra.mxu0 %v2644_v39  ;;  %1946 = vmatpush3.msra.mxu1 %v2673_v53 }
 0x184   :  { %1904 = vmatprep.subr.mxu0 %v2123_v0  ;;  %1947 = vmatprep.subr.mxu1 %v2123_v0 }
 0x185   :  { %1905 = vmatpush3.msra.mxu0 %v2656_v22  ;;  %1948 = vmatpush3.msra.mxu1 %v2675_v61 }
 0x186   :  { %1906 = vmatprep.subr.mxu0 %v2123_v0  ;;  %1950 = vmatmul.mubr.f32.vlgmr.msra.gmra.mxu1 %v822_v25 }
 0x187   :  { %1987 = vmatprep.subr.mxu1 %v2123_v0  ;;  %1907 = vmatpush3.msra.mxu0 %v2671_v48 }
 0x188   :  { %1988 = vmatpush3.msra.mxu1 %v2529_v10  ;;  %1908 = vmatprep.subr.mxu0 %v2123_v0  ;;  %v2897_v10 = vand.u32 4294901760, %v2671_v48 }
 0x189   :  { %1989 = vmatprep.subr.mxu1 %v2123_v0  ;;  %1909 = vmatpush3.msra.mxu0 %v2683_v19 }
 0x18a   :  { %1990 = vmatpush3.msra.mxu1 %v2531_v11  ;;  %1910 = vmatprep.subr.mxu0 %v2123_v0  ;;  %v2898_v11 = vand.u32 4294901760, %v2683_v19 }
 0x18b   :  { %1991 = vmatprep.subr.mxu1 %v2123_v0  ;;  %1911 = vmatpush3.msra.mxu0 %v2688_v31 }
 0x18c   :  { %1992 = vmatpush3.msra.mxu1 %v2533_v12  ;;  %1912 = vmatprep.subr.mxu0 %v2123_v0  ;;  %v2899_v12 = vand.u32 4294901760, %v2688_v31 }
 0x18d   :  { %1993 = vmatprep.subr.mxu1 %v2123_v0  ;;  %1913 = vmatpush3.msra.mxu0 %v2691_v42 }
 0x18e   :  { %1914 = vmatprep.mubr.msk.f32.mxu0 %vm2124_vm0, %v2123_v0  ;;  %1994 = vmatpush3.msra.mxu1 %v2564_v30 }
 0x18f   :  { %1915 = vmatmul.mubr.f32.vlgmr.msra.gmra.mxu0 %v2728_v63  ;;  %1952 = vmatprep.subr.mxu0 %v2123_v0 }
 0x190   :  { %1995 = vmatprep.subr.mxu1 %v2123_v0  ;;  %1953 = vmatpush3.msra.mxu0 %v833_v18 }
 0x191   :  { %1996 = vmatpush3.msra.mxu1 %v2570_v40  ;;  %1954 = vmatprep.subr.mxu0 %v2123_v0 }
 0x192   :  { %1997 = vmatprep.subr.mxu1 %v2123_v0  ;;  %1955 = vmatpush3.msra.mxu0 %v840_v20 }
 0x193   :  { %1998 = vmatpush3.msra.mxu1 %v2578_v47  ;;  %1956 = vmatprep.subr.mxu0 %v2123_v0 }
 0x194   :  { %1999 = vmatprep.subr.mxu1 %v2123_v0  ;;  %1957 = vmatpush3.msra.mxu0 %v847_v21 }
 0x195   :  { %2000 = vmatpush3.msra.mxu1 %v2589_v59  ;;  %1958 = vmatprep.subr.mxu0 %v2123_v0 }
 0x196   :  { %2001 = vmatprep.subr.mxu1 %v2123_v0  ;;  %1959 = vmatpush3.msra.mxu0 %v854_v45 }
 0x197   :  { %2002 = vmatpush3.msra.mxu1 %v2601_v13  ;;  %1960 = vmatprep.subr.mxu0 %v2123_v0 }
 0x198   :  { %2003 = vmatprep.subr.mxu1 %v2123_v0  ;;  %1961 = vmatpush3.msra.mxu0 %v861_v55 }
 0x199   :  { %2004 = vmatpush3.msra.mxu1 %v2608_v37  ;;  %1962 = vmatprep.subr.mxu0 %v2123_v0 }
 0x19a   :  { %2005 = vmatprep.subr.mxu1 %v2123_v0  ;;  %1963 = vmatpush3.msra.mxu0 %v868_v3 }
 0x19b   :  { %2006 = vmatpush3.msra.mxu1 %v2621_v54  ;;  %1964 = vmatprep.subr.mxu0 %v2123_v0 }
 0x19c   :  { %2007 = vmatprep.subr.mxu1 %v2123_v0  ;;  %1965 = vmatpush3.msra.mxu0 %v875_v32 }
 0x19d   :  { %2008 = vmatpush3.msra.mxu1 %v2631_v7  ;;  %1966 = vmatprep.subr.mxu0 %v2123_v0 }
 0x19e   :  { %2009 = vmatprep.subr.mxu1 %v2123_v0  ;;  %1967 = vmatpush3.msra.mxu0 %v882_v56 }
 0x19f   :  { %2010 = vmatpush3.msra.mxu1 %v2646_v41  ;;  %1968 = vmatprep.subr.mxu0 %v2123_v0 }
 0x1a0   :  { %2011 = vmatprep.subr.mxu1 %v2123_v0  ;;  %1969 = vmatpush3.msra.mxu0 %v889_v1 }
 0x1a1   :  { %2012 = vmatpush3.msra.mxu1 %v2659_v23  ;;  %1970 = vmatprep.subr.mxu0 %v2123_v0 }
 0x1a2   :  { %2013 = vmatprep.subr.mxu1 %v2123_v0  ;;  %1971 = vmatpush3.msra.mxu0 %v896_v36 }
 0x1a3   :  { %2014 = vmatpush3.msra.mxu1 %v2667_v29  ;;  %1972 = vmatprep.subr.mxu0 %v2123_v0 }
 0x1a4   :  { %2015 = vmatprep.subr.mxu1 %v2123_v0  ;;  %1973 = vmatpush3.msra.mxu0 %v903_v6 }
 0x1a5   :  { %2016 = vmatpush3.msra.mxu1 %v2673_v53  ;;  %1974 = vmatprep.subr.mxu0 %v2123_v0 }
 0x1a6   :  { %2017 = vmatprep.subr.mxu1 %v2123_v0  ;;  %1975 = vmatpush3.msra.mxu0 %v910_v28 }
 0x1a7   :  { %2018 = vmatpush3.msra.mxu1 %v2675_v61  ;;  %2019 = vmatprep.mubr.msk.f32.mxu1 %vm2124_vm0, %v2123_v0 }
 0x1a8   :  { %1976 = vmatprep.subr.mxu0 %v2123_v0  ;;  %2020 = vmatmul.mubr.f32.vlgmr.msra.gmra.mxu1 %v2724_v26 }
 0x1a9   :  { %1977 = vmatpush3.msra.mxu0 %v2897_v10  ;;  %1984 = vmatprep.mubr.msk.f32.mxu0 %vm2124_vm0, %v2123_v0 }
 0x1aa   :  { %1978 = vmatprep.subr.mxu0 %v2123_v0 }
 0x1ab   :  { %1979 = vmatpush3.msra.mxu0 %v2898_v11 }
 0x1ac   :  { %1980 = vmatprep.subr.mxu0 %v2123_v0 }
 0x1ad   :  { %1981 = vmatpush3.msra.mxu0 %v2899_v12 }
 0x1ae   :  { %1982 = vmatprep.subr.mxu0 %v2123_v0 }
 0x1af   :  { %1983 = vmatpush3.msra.mxu0 %v2900_v15 }
 0x1b0   :  { %1985 = vmatmul.mubr.f32.vlgmr.msra.gmra.mxu0 %v2724_v26 }
 0x226   :  { %v977_v16 = vpop.f32.mrf.mxu1 }
 0x228   :  { %v1881_v17 = vpop.f32.mrf.mxu1 }
 0x22e   :  { %v826_v18 = vpop.f32.mrf.mxu0 }
 0x22f   :  { %v978_v46 = vadd.f32 %v977_v16, %v826_v18 }
 0x230   :  { %v1846_v20 = vpop.f32.mrf.mxu0 }
 0x246   :  { %v1170_v21 = vpop.f32.mrf.mxu1 }
 0x248   :  { %v1951_v30 = vpop.f32.mrf.mxu1 }
 0x24f   :  { %v1081_v35 = vpop.f32.mrf.mxu0 }
 0x250   :  { %v1082_v55 = vadd.f32 %v1081_v35, %v978_v46 }
 0x251   :  { %v1916_v40 = vpop.f32.mrf.mxu0 }
 0x252   :  { %v1171_v57 = vadd.f32 %v1170_v21, %v1082_v55 }
 0x268   :  { %v1376_v45 = vpop.f32.mrf.mxu1 }
 0x26a   :  { %v2021_v47 = vpop.f32.mrf.mxu1 }
 0x270   :  { %v1289_v59 = vpop.f32.mrf.mxu0 }
 0x271   :  { %v1290_v0 = vadd.f32 %v1289_v59, %v1171_v57 }
 0x272   :  { %v1986_v3 = vpop.f32.mrf.mxu0 }
 0x273   :  { %v1377_v8 = vadd.f32 %v1376_v45, %v1290_v0 }
 0x275   :  { %1380 = vst [vmem:[#allocation8] sm:$0xff] %v1377_v8 }
 0x276   :  { %2103 = shalt.err (!%p2100_p5)
}
 0x277   :  { %1390 = dma.vmem_to_hbm [thread:$0]  %s1388_s5, 128, %s2892_s4, [#allocation4]  }
 0x278   :  { %2116 = dma.done.wait [#allocation4], 128  }
 0x279   :  { %2117 = vsyncadd [#allocation4], 4294967168 }
 0x27a   :  { %1394 = vsyncpa [#allocation3], 1 }
 0x27b   :  { %1395 = vsyncpa [#allocation6], 1 }
 0x27c   :  { %1396 = vsyncpa [#allocation4], 1 }

</bundles_post_ra>
